<compile_context>
chip_gen: v7x
topology: tpu7x:2x2x1
jax: 0.10.0
libtpu: 0.0.40
codegen_flags: <defaults>
</compile_context>

<pallas_src>
import functools

import jax
import jax.numpy as jnp
from jax.experimental import pallas as pl
from jax.experimental.pallas import tpu as pltpu

NUM_TRAIN_STEPS = 100
LANE = 128


def _round_up(x, m):
    return (x + m - 1) // m * m


def _flow_loss_kernel(action_ref, noise_ref, tcont_ref, obs_ref,
                      w1_ref, b1_ref, w2_ref, b2_ref, w3_ref, b3_ref,
                      partial_ref, slab_ref,
                      *, ta, obs_dim, batch, tile_b):
    i = pl.program_id(0)

    a = action_ref[...]          # (TB, TA)  f32
    n = noise_ref[...]           # (TB, TA)  f32
    tc = tcont_ref[...]          # (TB, 1)   f32
    ob = obs_ref[...]            # (TB, OBS) f32

    # FlowPolicy.forward elementwise part (kept in f32 on the VPU).
    direction = n - a                                   # noise - action
    noisy = a + tc * direction                          # broadcast tcont over features
    # t = (tcont * num_train_steps).long(); synthetic net consumes t / num_train_steps
    t_norm = jnp.floor(tc * NUM_TRAIN_STEPS) * (1.0 / NUM_TRAIN_STEPS)

    # Fused layer-1 input slab: [noisy | obs | t_norm | 0-pad] -> (TB, K_PAD=128).
    slab_ref[...] = jnp.zeros_like(slab_ref)
    slab_ref[:, 0:ta] = noisy
    slab_ref[:, ta:ta + obs_dim] = ob
    slab_ref[:, ta + obs_dim:ta + obs_dim + 1] = t_norm

    # MLP: bf16 operands into the MXU, f32 accumulation / bias / ReLU.
    x = slab_ref[...].astype(jnp.bfloat16)
    h1 = jnp.dot(x, w1_ref[...], preferred_element_type=jnp.float32) + b1_ref[...]
    h1 = jnp.maximum(h1, 0.0)
    h2 = jnp.dot(h1.astype(jnp.bfloat16), w2_ref[...],
                 preferred_element_type=jnp.float32) + b2_ref[...]
    h2 = jnp.maximum(h2, 0.0)
    pred = jnp.dot(h2.astype(jnp.bfloat16), w3_ref[...],
                   preferred_element_type=jnp.float32) + b3_ref[...]

    # Per-tile partial sum of squared error; mask rows past the true batch size
    # (partial last tile).  Mean / divide happens once in the wrapper.
    diff = pred - direction
    sq = diff * diff
    row = i * tile_b + jax.lax.broadcasted_iota(jnp.int32, (tile_b, 1), 0)
    sq = jnp.where(row < batch, sq, 0.0)
    total = jnp.sum(jnp.sum(sq, axis=1, keepdims=True), axis=0, keepdims=True)  # (1,1)
    partial_ref[...] = jnp.broadcast_to(total, (1, LANE))   # lane-dense store


def flow_policy_loss(obs, action, noise, tcont, params, *, tile_b=128):
    """Pallas implementation of FlowPolicy.forward (noise/tcont passed in for determinism)."""
    B, T, A = action.shape
    TA = T * A
    OBS = obs.shape[1]
    H = params["w2"].shape[0]

    K = TA + OBS + 1
    K_PAD = _round_up(K, LANE)
    H_PAD = _round_up(H, LANE)

    num_tiles = pl.cdiv(B, tile_b)
    B_pad = num_tiles * tile_b
    pad_b = B_pad - B

    # Flatten action/noise and zero-pad the batch up to a multiple of tile_b.
    action_f = jnp.pad(action.reshape(B, TA), ((0, pad_b), (0, 0)))
    noise_f = jnp.pad(noise.reshape(B, TA), ((0, pad_b), (0, 0)))
    tcont_2d = jnp.pad(tcont.reshape(B, 1), ((0, pad_b), (0, 0)))
    obs_p = jnp.pad(obs, ((0, pad_b), (0, 0)))

    # Fused, zero-padded layer-1 weight [w1a; w1o; w1t] -> (K_PAD, H_PAD).
    w1 = jnp.zeros((K_PAD, H_PAD), jnp.float32)
    w1 = w1.at[0:TA, 0:H].set(params["w1a"])
    w1 = w1.at[TA:TA + OBS, 0:H].set(params["w1o"])
    w1 = w1.at[TA + OBS, 0:H].set(params["w1t"][0])
    b1 = jnp.zeros((1, H_PAD), jnp.float32).at[:, :H].set(params["b1"])
    w2 = jnp.zeros((H_PAD, H_PAD), jnp.float32).at[:H, :H].set(params["w2"])
    b2 = jnp.zeros((1, H_PAD), jnp.float32).at[:, :H].set(params["b2"])
    w3 = jnp.zeros((H_PAD, TA), jnp.float32).at[:H, :].set(params["w3"])
    b3 = params["b3"].astype(jnp.float32)

    # bf16 weights for the MXU (f32 accumulation in-kernel).
    w1b = w1.astype(jnp.bfloat16)
    w2b = w2.astype(jnp.bfloat16)
    w3b = w3.astype(jnp.bfloat16)

    kernel = functools.partial(_flow_loss_kernel, ta=TA, obs_dim=OBS,
                               batch=B, tile_b=tile_b)

    def batch_spec(cols):
        return pl.BlockSpec((tile_b, cols), lambda i: (i, 0))

    def resident_spec(shape):
        return pl.BlockSpec(shape, lambda i: (0, 0))

    partials = pl.pallas_call(
        kernel,
        out_shape=jax.ShapeDtypeStruct((1, num_tiles * LANE), jnp.float32),
        grid=(num_tiles,),
        in_specs=[batch_spec(TA), batch_spec(TA), batch_spec(1), batch_spec(OBS),
                  resident_spec(w1b.shape), resident_spec(b1.shape),
                  resident_spec(w2b.shape), resident_spec(b2.shape),
                  resident_spec(w3b.shape), resident_spec(b3.shape)],
        out_specs=pl.BlockSpec((1, LANE), lambda i: (0, i)),
        scratch_shapes=[pltpu.VMEM((tile_b, K_PAD), jnp.float32)],
        compiler_params=pltpu.CompilerParams(
            dimension_semantics=("parallel",)),
    )(action_f, noise_f, tcont_2d, obs_p, w1b, b1, w2b, b2, w3b, b3)

    total = jnp.sum(partials.reshape(num_tiles, LANE)[:, 0])
    return total * (1.0 / (B * TA))


def reference_loss(obs, action, noise, tcont, params):
    """Pure-JAX f32 reference mirroring FlowPolicy.forward with the same synthetic net."""
    B, T, A = action.shape
    TA = T * A
    direction = noise - action
    noisy = action + tcont[:, None, None] * direction
    t_norm = jnp.floor(tcont * NUM_TRAIN_STEPS) / NUM_TRAIN_STEPS
    x = noisy.reshape(B, TA)
    h1 = (x @ params["w1a"] + obs @ params["w1o"]
          + t_norm[:, None] * params["w1t"] + params["b1"])
    h1 = jnp.maximum(h1, 0.0)
    h2 = jnp.maximum(h1 @ params["w2"] + params["b2"], 0.0)
    pred = (h2 @ params["w3"] + params["b3"]).reshape(B, T, A)
    return jnp.mean((pred - direction) ** 2)


if __name__ == "__main__":
    # Small shapes consistent with FlowPolicy: action_len=8, action_dim=4,
    # obs_dim=32, hidden=64.  B=200 (not a multiple of the 128-row tile) so the
    # partial-tile masking path is exercised.
    B, T, A, OBS, H = 200, 8, 4, 32, 64
    TA = T * A

    key = jax.random.PRNGKey(0)
    keys = jax.random.split(key, 12)
    obs = jax.random.normal(keys[0], (B, OBS), jnp.float32)
    action = jax.random.normal(keys[1], (B, T, A), jnp.float32)
    # torch.randn_like(action) / torch.rand((B,)) -> deterministic JAX equivalents
    noise = jax.random.normal(keys[2], (B, T, A), jnp.float32)
    tcont = jax.random.uniform(keys[3], (B,), jnp.float32)

    params = {
        "w1a": 0.05 * jax.random.normal(keys[4], (TA, H), jnp.float32),
        "w1o": 0.05 * jax.random.normal(keys[5], (OBS, H), jnp.float32),
        "w1t": 0.05 * jax.random.normal(keys[6], (1, H), jnp.float32),
        "b1": 0.02 * jax.random.normal(keys[7], (1, H), jnp.float32),
        "w2": 0.05 * jax.random.normal(keys[8], (H, H), jnp.float32),
        "b2": 0.02 * jax.random.normal(keys[9], (1, H), jnp.float32),
        "w3": 0.05 * jax.random.normal(keys[10], (H, TA), jnp.float32),
        "b3": 0.02 * jax.random.normal(keys[11], (1, TA), jnp.float32),
    }

    loss = flow_policy_loss(obs, action, noise, tcont, params, tile_b=128)
    loss = jax.block_until_ready(loss)

    ref = reference_loss(obs, action, noise, tcont, params)
    assert jnp.isfinite(loss), "kernel produced non-finite loss"
    assert jnp.allclose(loss, ref, rtol=2e-2, atol=2e-3), (loss, ref)

    print("KERNEL_OK")
</pallas_src>

<mosaic_0001>
module attributes {stable_mosaic.version = 11 : i64} {
  func.func @_flow_loss_kernel(%arg0: i32, %arg1: memref<128x32xf32, #tpu.memory_space<vmem>>, %arg2: memref<128x32xf32, #tpu.memory_space<vmem>>, %arg3: memref<128x1xf32, #tpu.memory_space<vmem>>, %arg4: memref<128x32xf32, #tpu.memory_space<vmem>>, %arg5: memref<128x128xbf16, #tpu.memory_space<vmem>>, %arg6: memref<1x128xf32, #tpu.memory_space<vmem>>, %arg7: memref<128x128xbf16, #tpu.memory_space<vmem>>, %arg8: memref<1x128xf32, #tpu.memory_space<vmem>>, %arg9: memref<128x32xbf16, #tpu.memory_space<vmem>>, %arg10: memref<1x32xf32, #tpu.memory_space<vmem>>, %arg11: memref<1x128xf32, #tpu.memory_space<vmem>>, %arg12: memref<128x128xf32, #tpu.memory_space<vmem>>) attributes {dimension_semantics = [#tpu.dimension_semantics<parallel>], iteration_bounds = array<i64: 2>, scalar_prefetch = 0 : i64, scratch_operands = 1 : i64, tpu.core_type = #tpu.core_type<tc>, window_params = [{transform_indices = @transform_0, window_bounds = array<i64: 128, 32>}, {transform_indices = @transform_1, window_bounds = array<i64: 128, 32>}, {transform_indices = @transform_2, window_bounds = array<i64: 128, 1>}, {transform_indices = @transform_3, window_bounds = array<i64: 128, 32>}, {pipeline_mode = #tpu.pipeline_mode<synchronous>, transform_indices = @transform_4, window_bounds = array<i64: 128, 128>}, {pipeline_mode = #tpu.pipeline_mode<synchronous>, transform_indices = @transform_5, window_bounds = array<i64: 1, 128>}, {pipeline_mode = #tpu.pipeline_mode<synchronous>, transform_indices = @transform_6, window_bounds = array<i64: 128, 128>}, {pipeline_mode = #tpu.pipeline_mode<synchronous>, transform_indices = @transform_7, window_bounds = array<i64: 1, 128>}, {pipeline_mode = #tpu.pipeline_mode<synchronous>, transform_indices = @transform_8, window_bounds = array<i64: 128, 32>}, {pipeline_mode = #tpu.pipeline_mode<synchronous>, transform_indices = @transform_9, window_bounds = array<i64: 1, 32>}, {transform_indices = @transform_10, window_bounds = array<i64: 1, 128>}]} {
    %c0 = arith.constant 0 : index
    %c0_0 = arith.constant 0 : index
    %0 = vector.load %arg1[%c0, %c0_0] : memref<128x32xf32, #tpu.memory_space<vmem>>, vector<128x32xf32>
    %c0_1 = arith.constant 0 : index
    %c0_2 = arith.constant 0 : index
    %1 = vector.load %arg2[%c0_1, %c0_2] : memref<128x32xf32, #tpu.memory_space<vmem>>, vector<128x32xf32>
    %c0_3 = arith.constant 0 : index
    %c0_4 = arith.constant 0 : index
    %2 = vector.load %arg3[%c0_3, %c0_4] : memref<128x1xf32, #tpu.memory_space<vmem>>, vector<128x1xf32>
    %c0_5 = arith.constant 0 : index
    %c0_6 = arith.constant 0 : index
    %3 = vector.load %arg4[%c0_5, %c0_6] : memref<128x32xf32, #tpu.memory_space<vmem>>, vector<128x32xf32>
    %4 = arith.subf %1, %0 : vector<128x32xf32>
    %5 = vector.broadcast %2 : vector<128x1xf32> to vector<128x32xf32>
    %6 = arith.mulf %5, %4 : vector<128x32xf32>
    %7 = arith.addf %0, %6 : vector<128x32xf32>
    %cst = arith.constant 1.000000e+02 : f32
    %8 = vector.broadcast %cst : f32 to vector<128x1xf32>
    %9 = arith.mulf %2, %8 : vector<128x1xf32>
    %10 = math.floor %9 : vector<128x1xf32>
    %cst_7 = arith.constant 0.00999999977 : f32
    %11 = vector.broadcast %cst_7 : f32 to vector<128x1xf32>
    %12 = arith.mulf %10, %11 : vector<128x1xf32>
    %cst_8 = arith.constant 0.000000e+00 : f32
    %13 = vector.broadcast %cst_8 : f32 to vector<128x128xf32>
    %c0_9 = arith.constant 0 : index
    %c0_10 = arith.constant 0 : index
    %14 = vector.load %arg12[%c0_9, %c0_10] : memref<128x128xf32, #tpu.memory_space<vmem>>, vector<128x128xf32>
    tpu.vector_store %arg12[%c0_9, %c0_10], %13 {strides = array<i32>} : memref<128x128xf32, #tpu.memory_space<vmem>>, vector<128x128xf32>,
    %c0_11 = arith.constant 0 : index
    %c0_12 = arith.constant 0 : index
    %15 = vector.load %arg12[%c0_11, %c0_12] : memref<128x128xf32, #tpu.memory_space<vmem>>, vector<128x32xf32>
    tpu.vector_store %arg12[%c0_11, %c0_12], %7 {strides = array<i32>} : memref<128x128xf32, #tpu.memory_space<vmem>>, vector<128x32xf32>,
    %c0_13 = arith.constant 0 : index
    %c32 = arith.constant 32 : index
    %16 = vector.load %arg12[%c0_13, %c32] : memref<128x128xf32, #tpu.memory_space<vmem>>, vector<128x32xf32>
    tpu.vector_store %arg12[%c0_13, %c32], %3 {strides = array<i32>} : memref<128x128xf32, #tpu.memory_space<vmem>>, vector<128x32xf32>,
    %c0_14 = arith.constant 0 : index
    %c64 = arith.constant 64 : index
    %17 = vector.load %arg12[%c0_14, %c64] : memref<128x128xf32, #tpu.memory_space<vmem>>, vector<128x1xf32>
    tpu.vector_store %arg12[%c0_14, %c64], %12 {strides = array<i32>} : memref<128x128xf32, #tpu.memory_space<vmem>>, vector<128x1xf32>,
    %c0_15 = arith.constant 0 : index
    %c0_16 = arith.constant 0 : index
    %18 = vector.load %arg12[%c0_15, %c0_16] : memref<128x128xf32, #tpu.memory_space<vmem>>, vector<128x128xf32>
    %19 = arith.truncf %18 : vector<128x128xf32> to vector<128x128xbf16>
    %c0_17 = arith.constant 0 : index
    %c0_18 = arith.constant 0 : index
    %20 = vector.load %arg5[%c0_17, %c0_18] : memref<128x128xbf16, #tpu.memory_space<vmem>>, vector<128x128xbf16>
    %cst_19 = arith.constant dense<0.000000e+00> : vector<128x128xf32>
    %21 = tpu.matmul %19, %20, %cst_19 {dimension_numbers = #tpu.dot_dimension_numbers<[1], [0], [0], [1], [0, 0, 1, 1], [], []>} : vector<128x128xbf16>, vector<128x128xbf16>, vector<128x128xf32> -> vector<128x128xf32>
    %c0_20 = arith.constant 0 : index
    %c0_21 = arith.constant 0 : index
    %22 = vector.load %arg6[%c0_20, %c0_21] : memref<1x128xf32, #tpu.memory_space<vmem>>, vector<1x128xf32>
    %23 = vector.broadcast %22 : vector<1x128xf32> to vector<128x128xf32>
    %24 = arith.addf %21, %23 : vector<128x128xf32>
    %cst_22 = arith.constant 0.000000e+00 : f32
    %25 = vector.broadcast %cst_22 : f32 to vector<128x128xf32>
    %26 = arith.maximumf %24, %25 : vector<128x128xf32>
    %27 = arith.truncf %26 : vector<128x128xf32> to vector<128x128xbf16>
    %c0_23 = arith.constant 0 : index
    %c0_24 = arith.constant 0 : index
    %28 = vector.load %arg7[%c0_23, %c0_24] : memref<128x128xbf16, #tpu.memory_space<vmem>>, vector<128x128xbf16>
    %cst_25 = arith.constant dense<0.000000e+00> : vector<128x128xf32>
    %29 = tpu.matmul %27, %28, %cst_25 {dimension_numbers = #tpu.dot_dimension_numbers<[1], [0], [0], [1], [0, 0, 1, 1], [], []>} : vector<128x128xbf16>, vector<128x128xbf16>, vector<128x128xf32> -> vector<128x128xf32>
    %c0_26 = arith.constant 0 : index
    %c0_27 = arith.constant 0 : index
    %30 = vector.load %arg8[%c0_26, %c0_27] : memref<1x128xf32, #tpu.memory_space<vmem>>, vector<1x128xf32>
    %31 = vector.broadcast %30 : vector<1x128xf32> to vector<128x128xf32>
    %32 = arith.addf %29, %31 : vector<128x128xf32>
    %cst_28 = arith.constant 0.000000e+00 : f32
    %33 = vector.broadcast %cst_28 : f32 to vector<128x128xf32>
    %34 = arith.maximumf %32, %33 : vector<128x128xf32>
    %35 = arith.truncf %34 : vector<128x128xf32> to vector<128x128xbf16>
    %c0_29 = arith.constant 0 : index
    %c0_30 = arith.constant 0 : index
    %36 = vector.load %arg9[%c0_29, %c0_30] : memref<128x32xbf16, #tpu.memory_space<vmem>>, vector<128x32xbf16>
    %cst_31 = arith.constant dense<0.000000e+00> : vector<128x32xf32>
    %37 = tpu.matmul %35, %36, %cst_31 {dimension_numbers = #tpu.dot_dimension_numbers<[1], [0], [0], [1], [0, 0, 1, 1], [], []>} : vector<128x128xbf16>, vector<128x32xbf16>, vector<128x32xf32> -> vector<128x32xf32>
    %c0_32 = arith.constant 0 : index
    %c0_33 = arith.constant 0 : index
    %38 = vector.load %arg10[%c0_32, %c0_33] : memref<1x32xf32, #tpu.memory_space<vmem>>, vector<1x32xf32>
    %39 = vector.broadcast %38 : vector<1x32xf32> to vector<128x32xf32>
    %40 = arith.addf %37, %39 : vector<128x32xf32>
    %41 = arith.subf %40, %4 : vector<128x32xf32>
    %42 = arith.mulf %41, %41 : vector<128x32xf32>
    %c128_i32 = arith.constant 128 : i32
    %43 = arith.muli %arg0, %c128_i32 : i32
    %44 = tpu.iota {dimensions = array<i32: 0>} : vector<128x1xi32>
    %45 = vector.broadcast %43 : i32 to vector<128x1xi32>
    %46 = arith.addi %45, %44 : vector<128x1xi32>
    %c200_i32 = arith.constant 200 : i32
    %47 = vector.broadcast %c200_i32 : i32 to vector<128x1xi32>
    %48 = arith.cmpi slt, %46, %47 : vector<128x1xi32>
    %cst_34 = arith.constant 0.000000e+00 : f32
    %49 = vector.shape_cast %48 : vector<128x1xi1> to vector<128x1xi1>
    %50 = vector.broadcast %49 : vector<128x1xi1> to vector<128x32xi1>
    %51 = vector.broadcast %cst_34 : f32 to vector<128x32xf32>
    %52 = arith.select %50, %42, %51 : vector<128x32xi1>, vector<128x32xf32>
    %cst_35 = arith.constant dense<0.000000e+00> : vector<128xf32>
    %53 = vector.multi_reduction <add>, %52, %cst_35 [1] : vector<128x32xf32> to vector<128xf32>
    %54 = vector.shape_cast %53 : vector<128xf32> to vector<128x1xf32>
    %cst_36 = arith.constant dense<0.000000e+00> : vector<1xf32>
    %55 = vector.multi_reduction <add>, %54, %cst_36 [0] : vector<128x1xf32> to vector<1xf32>
    %56 = vector.shape_cast %55 : vector<1xf32> to vector<1x1xf32>
    %57 = vector.shape_cast %56 : vector<1x1xf32> to vector<1x1xf32>
    %58 = vector.broadcast %57 : vector<1x1xf32> to vector<1x128xf32>
    %c0_37 = arith.constant 0 : index
    %c0_38 = arith.constant 0 : index
    %59 = vector.load %arg11[%c0_37, %c0_38] : memref<1x128xf32, #tpu.memory_space<vmem>>, vector<1x128xf32>
    tpu.vector_store %arg11[%c0_37, %c0_38], %58 {strides = array<i32>} : memref<1x128xf32, #tpu.memory_space<vmem>>, vector<1x128xf32>,
    return
  }
  func.func @transform_0(%arg0: i32) -> (i32, i32) {
    %c0_i32 = arith.constant 0 : i32
    %c0_i32_0 = arith.constant 0 : i32
    return %arg0, %c0_i32 : i32, i32
  }
  func.func @transform_1(%arg0: i32) -> (i32, i32) {
    %c0_i32 = arith.constant 0 : i32
    %c0_i32_0 = arith.constant 0 : i32
    return %arg0, %c0_i32 : i32, i32
  }
  func.func @transform_2(%arg0: i32) -> (i32, i32) {
    %c0_i32 = arith.constant 0 : i32
    %c0_i32_0 = arith.constant 0 : i32
    return %arg0, %c0_i32 : i32, i32
  }
  func.func @transform_3(%arg0: i32) -> (i32, i32) {
    %c0_i32 = arith.constant 0 : i32
    %c0_i32_0 = arith.constant 0 : i32
    return %arg0, %c0_i32 : i32, i32
  }
  func.func @transform_4(%arg0: i32) -> (i32, i32) {
    %c0_i32 = arith.constant 0 : i32
    %c0_i32_0 = arith.constant 0 : i32
    %c0_i32_1 = arith.constant 0 : i32
    return %c0_i32, %c0_i32_0 : i32, i32
  }
  func.func @transform_5(%arg0: i32) -> (i32, i32) {
    %c0_i32 = arith.constant 0 : i32
    %c0_i32_0 = arith.constant 0 : i32
    %c0_i32_1 = arith.constant 0 : i32
    return %c0_i32, %c0_i32_0 : i32, i32
  }
  func.func @transform_6(%arg0: i32) -> (i32, i32) {
    %c0_i32 = arith.constant 0 : i32
    %c0_i32_0 = arith.constant 0 : i32
    %c0_i32_1 = arith.constant 0 : i32
    return %c0_i32, %c0_i32_0 : i32, i32
  }
  func.func @transform_7(%arg0: i32) -> (i32, i32) {
    %c0_i32 = arith.constant 0 : i32
    %c0_i32_0 = arith.constant 0 : i32
    %c0_i32_1 = arith.constant 0 : i32
    return %c0_i32, %c0_i32_0 : i32, i32
  }
  func.func @transform_8(%arg0: i32) -> (i32, i32) {
    %c0_i32 = arith.constant 0 : i32
    %c0_i32_0 = arith.constant 0 : i32
    %c0_i32_1 = arith.constant 0 : i32
    return %c0_i32, %c0_i32_0 : i32, i32
  }
  func.func @transform_9(%arg0: i32) -> (i32, i32) {
    %c0_i32 = arith.constant 0 : i32
    %c0_i32_0 = arith.constant 0 : i32
    %c0_i32_1 = arith.constant 0 : i32
    return %c0_i32, %c0_i32_0 : i32, i32
  }
  func.func @transform_10(%arg0: i32) -> (i32, i32) {
    %c0_i32 = arith.constant 0 : i32
    %c0_i32_0 = arith.constant 0 : i32
    return %c0_i32, %arg0 : i32, i32
  }
}

</mosaic_0001>

<bundles_post_ra>
// kernel: tpu_custom_call.1
= control target key start
LH: loop header
LB: loop body
LE: loop exit
PB: predicated region body
PF: predicated region fallthrough
CT: control target
= control target key end

     0   :  { %15 = vsyncpa [#allocation4], 0  ;;  %s2658_s0 = inlined_call_operand.vmem [shape: f32[256,32], index: 0, kind: input, shape index: {}]   ;;  %s2659_s1 = inlined_call_operand.vmem [shape: f32[256,32], index: 1, kind: input, shape index: {}]   ;;  %s2660_s2 = inlined_call_operand.vmem [shape: f32[256,1], index: 2, kind: input, shape index: {}]   ;;  %s2661_s3 = inlined_call_operand.vmem [shape: f32[256,32], index: 3, kind: input, shape index: {}]   ;;  %s2662_s4 = inlined_call_operand.vmem [shape: bf16[128,128], index: 4, kind: input, shape index: {}]   ;;  %s2663_s5 = inlined_call_operand.vmem [shape: f32[1,128], index: 5, kind: input, shape index: {}]   ;;  %s2664_s6 = inlined_call_operand.vmem [shape: bf16[128,128], index: 6, kind: input, shape index: {}]   ;;  %s2665_s7 = inlined_call_operand.vmem [shape: f32[1,128], index: 7, kind: input, shape index: {}]   ;;  %s2666_s8 = inlined_call_operand.vmem [shape: bf16[128,32], index: 8, kind: input, shape index: {}]   ;;  %s2667_s9 = inlined_call_operand.vmem [shape: f32[1,32], index: 9, kind: input, shape index: {}]   ;;  %s2668_s10 = inlined_call_operand.hbm [shape: f32[1,256], index: 10, kind: output, shape index: {}]  }
   0x1   :  { %17 = vsyncpa [#allocation4 + $0x1], 0  ;;  %s2138_s13 = smov 0   ;;  %s2140_s14 = smov 0  }
   0x2   :  { %s2142_s15 = smov 0   ;;  %s2144_s16 = smov 0  }
   0x3 LB: > { %s2159_s17 = sadd.s32 4294967295, %s2076_s16   ;;  %s1742_s18 = sadd.s32 4294967294, %s2076_s16   ;;  %s2076_s16 = sphi %s2144_s16, %s2674_s16   ;;  %s2072_s15 = sphi %s2142_s15, %s2673_s15   ;;  %s2068_s14 = sphi %s2140_s14, %s2672_s14   ;;  %s2064_s13 = sphi %s2138_s13, %s2671_s13  }
   0x4   : > { %s2163_s19 = sadd.s32 1, %s2076_s16   ;;  %s260_s20 = sadd.s32 1, %s2072_s15 }
   0x5   : > { %s257_s21 = ssub.s32 %s2076_s16, %s2163_s19  ;;  %p270_p0 = scmp.ne.s32.totalorder %s2072_s15, %s2068_s14 }
   0x6   : > { %p258_p1 = scmp.eq.s32.totalorder %s257_s21, 0  ;;  %p271_p2 = scmp.eq.s32.totalorder %s2159_s17, 1 }
   0x7   : > { %p276_p3 = scmp.ne.s32.totalorder %s2068_s14, %s2064_s13  ;;  %p277_p4 = scmp.eq.s32.totalorder %s1742_s18, 1 }
   0x8   : > { %s2174_s22 = scalar_select %p258_p1, %s2072_s15, %s260_s20  }
   0x9   : > { %p2176_p5 = por %p271_p2, %p270_p0  ;;  %p2180_p6 = por %p277_p4, %p276_p3 }
   0xa   : > { %p1745_p7 = scmp.ge.s32.totalorder %s2076_s16, 1  ;;  %p349_p8 = scmp.lt.s32.totalorder %s2076_s16, 3 }
   0xc   : > { %p350_p9 = pnand %p1745_p7, %p349_p8 }
   0xd   : > { %s2187_s25 = sshll.u32 (!%p350_p9), %s2159_s17, 4  ;;  %v2078_v0 = vmov (!%p350_p9), 0   ;;  %v2079_v9 = vmov (!%p350_p9), 0.0   ;;  %s2080_s20 = smov (!%p350_p9), 32   ;;  %v1990_v19 = vld [vmem:[%s2662_s4] sm:$0xff] (!%p350_p9)   ;;  %v1991_v22 = vld [vmem:[%s2662_s4 + $0x8] sm:$0xff] (!%p350_p9)  }
   0xe   : > { %353 = sbr.rel (%p350_p9) target bundleno = 1097 (0x449), region = 60  ;;  %1989 = vset.pattern.permute.xlu1 (!%p350_p9), %v2078_v0  ;;  %1988 = vset.pattern.permute.xlu0 (!%p350_p9), %v2078_v0  ;;  %p402_p10 = scmp.lt.s32.totalorder (!%p350_p9), %s2187_s25, 31  ;;  %667 = vst [vmem:[#allocation2 + $0x8] sm:$0xff] (!%p350_p9), %v2079_v9  ;;  %666 = vst [vmem:[#allocation2] sm:$0xff] (!%p350_p9), %v2079_v9  ;;  %v1992_v27 = vld [vmem:[%s2662_s4 + $0x10] sm:$0xff] (!%p350_p9)   ;;  %v1993_v29 = vld [vmem:[%s2662_s4 + $0x18] sm:$0xff] (!%p350_p9)  }
   0xf   : > { %668 = vst [vmem:[#allocation2 + $0x10] sm:$0xff] (!%p350_p9), %v2079_v9  ;;  %669 = vst [vmem:[#allocation2 + $0x18] sm:$0xff] (!%p350_p9), %v2079_v9  ;;  %1833 = vmatprep.subr.bf16.mxu0 (!%p350_p9), %v1990_v19  ;;  %s2081_s21 = smov (!%p350_p9), 64   ;;  %v1994_v32 = vld [vmem:[%s2662_s4 + $0x20] sm:$0xff] (!%p350_p9)   ;;  %v1995_v35 = vld [vmem:[%s2662_s4 + $0x28] sm:$0xff] (!%p350_p9)   ;;  %vm682_vm0 = vcmask (!%p350_p9), 261120  }
  0x10   : > { %670 = vst [vmem:[#allocation2 + $0x20] sm:$0xff] (!%p350_p9), %v2079_v9  ;;  %671 = vst [vmem:[#allocation2 + $0x28] sm:$0xff] (!%p350_p9), %v2079_v9  ;;  %1834 = vmatpush3.bf16.msra.mxu0 (!%p350_p9), %v1990_v19  ;;  %v1996_v40 = vld [vmem:[%s2662_s4 + $0x30] sm:$0xff] (!%p350_p9)   ;;  %v1997_v47 = vld [vmem:[%s2662_s4 + $0x38] sm:$0xff] (!%p350_p9)   ;;  %vm763_vm1 = vcmask (!%p350_p9), 523520   ;;  %vm844_vm2 = vcmask (!%p350_p9), 531968  }
  0x11   : > { %672 = vst [vmem:[#allocation2 + $0x30] sm:$0xff] (!%p350_p9), %v2079_v9  ;;  %673 = vst [vmem:[#allocation2 + $0x38] sm:$0xff] (!%p350_p9), %v2079_v9  ;;  %1835 = vmatprep.subr.bf16.mxu0 (!%p350_p9), %v1991_v22 }
  0x12   : > { %674 = vst [vmem:[#allocation2 + $0x40] sm:$0xff] (!%p350_p9), %v2079_v9  ;;  %675 = vst [vmem:[#allocation2 + $0x48] sm:$0xff] (!%p350_p9), %v2079_v9 }
  0x13   : > { %676 = vst [vmem:[#allocation2 + $0x50] sm:$0xff] (!%p350_p9), %v2079_v9  ;;  %677 = vst [vmem:[#allocation2 + $0x58] sm:$0xff] (!%p350_p9), %v2079_v9 }
  0x14   : > { %678 = vst [vmem:[#allocation2 + $0x60] sm:$0xff] (!%p350_p9), %v2079_v9  ;;  %679 = vst [vmem:[#allocation2 + $0x68] sm:$0xff] (!%p350_p9), %v2079_v9  ;;  %1836 = vmatpush3.bf16.msra.mxu0 (!%p350_p9), %v1991_v22 }
  0x15   : > { %s403_s26 = scalar_select %p402_p10, %s2187_s25, 31  ;;  %680 = vst [vmem:[#allocation2 + $0x70] sm:$0xff] %v2079_v9  ;;  %681 = vst [vmem:[#allocation2 + $0x78] sm:$0xff] %v2079_v9  ;;  %1837 = vmatprep.subr.bf16.mxu0 %v1992_v27 }
  0x17   : > { %s2191_s27 = sshll.u32 %s403_s26, 3 }
  0x18   : > { %s2197_s30 = scalar_lea.vmem %s2660_s2, %s2191_s27  ;;  %s2221_s18 = scalar_lea.vmem %s2661_s3, %s2191_s27  ;;  %1838 = vmatpush3.bf16.msra.mxu0 %v1992_v27  ;;  %v1999_v27 = vld [vmem:[%s2664_s6 + $0x8] sm:$0xff]  }
  0x19   : > { %v460_v1 = vld [vmem:[%s2197_s30 + $0x10] sm:$0xff]  ;;  %v458_v2 = vld [vmem:[%s2197_s30] sm:$0xff]  ;;  %v461_v3 = vld [vmem:[%s2197_s30 + $0x18] sm:$0xff]  ;;  %1839 = vmatprep.subr.bf16.mxu0 %v1993_v29  ;;  %s2328_s28 = scalar_lea.vmem %s2658_s0, %s2191_s27  ;;  %s2334_s11 = scalar_lea.vmem %s2659_s1, %s2191_s27 }
  0x1a   : > { %518 = vperm.xlu1 %1989, %v460_v1   ;;  %508 = vperm.xlu0 %1988, %v458_v2   ;;  %v459_v4 = vld [vmem:[%s2197_s30 + $0x8] sm:$0xff]  ;;  %v2207_v6 = vld [vmem:[%s2197_s30 + $0x20] sm:$0xff]  ;;  %v2212_v7 = vld [vmem:[%s2197_s30 + $0x38] sm:$0xff]  ;;  %v620_v10 = vmul.f32 100.0, %v460_v1  ;;  %v618_v11 = vmul.f32 100.0, %v458_v2  ;;  %v621_v17 = vmul.f32 100.0, %v461_v3 }
  0x1b   : > { %v2204_v5 = vld [vmem:[%s2197_s30 + $0x28] sm:$0xff]  ;;  %v2215_v8 = vld [vmem:[%s2197_s30 + $0x30] sm:$0xff]  ;;  %v619_v12 = vmul.f32 100.0, %v459_v4  ;;  %v474_v14 = vld [vmem:[%s2221_s18] sm:$0xff]  ;;  %v622_v37 = vmul.f32 100.0, %v2207_v6  ;;  %v625_v43 = vmul.f32 100.0, %v2212_v7 }
  0x1c   : > { %v475_v13 = vld [vmem:[%s2221_s18 + $0x8] sm:$0xff]  ;;  %v636_v15 = vfloor.f32 %v620_v10  ;;  %v634_v16 = vfloor.f32 %v618_v11  ;;  %v477_v20 = vld [vmem:[%s2221_s18 + $0x18] sm:$0xff]  ;;  %v476_v21 = vld [vmem:[%s2221_s18 + $0x10] sm:$0xff]  ;;  %v637_v25 = vfloor.f32 %v621_v17  ;;  %1840 = vmatpush3.bf16.msra.mxu0 %v1993_v29  ;;  %v623_v36 = vmul.f32 100.0, %v2204_v5 }
  0x1d   : > { %v635_v18 = vfloor.f32 %v619_v12  ;;  %v467_v30 = vld [vmem:[%s2197_s30 + $0x48] sm:$0xff]  ;;  %v466_v31 = vld [vmem:[%s2197_s30 + $0x40] sm:$0xff]  ;;  %v469_v33 = vld [vmem:[%s2197_s30 + $0x58] sm:$0xff]  ;;  %1841 = vmatprep.subr.bf16.mxu0 %v1994_v32  ;;  %v638_v42 = vfloor.f32 %v622_v37  ;;  %v624_v44 = vmul.f32 100.0, %v2215_v8  ;;  %v641_v50 = vfloor.f32 %v625_v43 }
  0x1e   : > { %523 = vperm.xlu1 %1989, %v461_v3   ;;  %513 = vperm.xlu0 %1988, %v459_v4   ;;  %v652_v23 = vmul.f32 0.01, %v636_v15  ;;  %v650_v24 = vmul.f32 0.01, %v634_v16  ;;  %v653_v28 = vmul.f32 0.01, %v637_v25  ;;  %v639_v41 = vfloor.f32 %v623_v36 }
  0x1f   : > { %v651_v26 = vmul.f32 0.01, %v635_v18  ;;  %v468_v34 = vld [vmem:[%s2197_s30 + $0x50] sm:$0xff]  ;;  %v479_v38 = vld [vmem:[%s2221_s18 + $0x28] sm:$0xff]  ;;  %v478_v39 = vld [vmem:[%s2221_s18 + $0x20] sm:$0xff]  ;;  %v640_v51 = vfloor.f32 %v624_v44  ;;  %v627_v58 = vmul.f32 100.0, %v467_v30 }
  0x20   : > { %1842 = vmatpush3.bf16.msra.mxu0 %v1994_v32  ;;  %v481_v45 = vld [vmem:[%s2221_s18 + $0x38] sm:$0xff]  ;;  %v480_v46 = vld [vmem:[%s2221_s18 + $0x30] sm:$0xff]  ;;  %v655_v48 = vmul.f32 0.01, %v639_v41  ;;  %v654_v49 = vmul.f32 0.01, %v638_v42 }
  0x21   : > { %1843 = vmatprep.subr.bf16.mxu0 %v1995_v35  ;;  %v657_v52 = vmul.f32 0.01, %v641_v50  ;;  %v656_v53 = vmul.f32 0.01, %v640_v51  ;;  %v471_v54 = vld [vmem:[%s2197_s30 + $0x68] sm:$0xff]  ;;  %v470_v55 = vld [vmem:[%s2197_s30 + $0x60] sm:$0xff]  ;;  %v643_v62 = vfloor.f32 %v627_v58 }
  0x22   : > { %533 = vperm.xlu1 %1989, %v2204_v5   ;;  %528 = vperm.xlu0 %1988, %v2207_v6   ;;  %v473_v56 = vld [vmem:[%s2197_s30 + $0x78] sm:$0xff]  ;;  %v472_v57 = vld [vmem:[%s2197_s30 + $0x70] sm:$0xff]  ;;  %v626_v59 = vmul.f32 100.0, %v466_v31  ;;  %v483_v60 = vld [vmem:[%s2221_s18 + $0x48] sm:$0xff]  ;;  %v629_v0 = vmul.f32 100.0, %v469_v33  ;;  %v628_v1 = vmul.f32 100.0, %v468_v34  ;;  %s2616_s30 = scalar_lea.hbm %s2668_s10, %s2187_s25 }
  0x23   : > { %v482_v61 = vld [vmem:[%s2221_s18 + $0x40] sm:$0xff]  ;;  %v485_v2 = vld [vmem:[%s2221_s18 + $0x58] sm:$0xff]  ;;  %v484_v3 = vld [vmem:[%s2221_s18 + $0x50] sm:$0xff]  ;;  %v659_v4 = vmul.f32 0.01, %v643_v62  ;;  %v631_v10 = vmul.f32 100.0, %v471_v54 }
  0x24   : > { %1844 = vmatpush3.bf16.msra.mxu0 %v1995_v35  ;;  %v642_v63 = vfloor.f32 %v626_v59  ;;  %v645_v6 = vfloor.f32 %v629_v0  ;;  %v630_v11 = vmul.f32 100.0, %v470_v55  ;;  %v487_v12 = vld [vmem:[%s2221_s18 + $0x68] sm:$0xff]  ;;  %v633_v16 = vmul.f32 100.0, %v473_v56  ;;  %v489_v18 = vld [vmem:[%s2221_s18 + $0x78] sm:$0xff]  ;;  %v488_v19 = vld [vmem:[%s2221_s18 + $0x70] sm:$0xff] }
  0x25   : > { %1845 = vmatprep.subr.bf16.mxu0 %v1996_v40  ;;  %v632_v17 = vmul.f32 100.0, %v472_v57  ;;  %v2001_v29 = vld [vmem:[%s2664_s6 + $0x18] sm:$0xff]   ;;  %v428_v32 = vld [vmem:[%s2328_s28 + $0x10] sm:$0xff]  ;;  %v442_v35 = vld [vmem:[%s2334_s11] sm:$0xff] }
  0x26   : > { %543 = vperm.xlu1 %1989, %v2212_v7   ;;  %538 = vperm.xlu0 %1988, %v2215_v8   ;;  %v658_v5 = vmul.f32 0.01, %v642_v63  ;;  %v644_v7 = vfloor.f32 %v628_v1  ;;  %v661_v8 = vmul.f32 0.01, %v645_v6  ;;  %v646_v15 = vfloor.f32 %v630_v11  ;;  %v443_v41 = vld [vmem:[%s2334_s11 + $0x8] sm:$0xff]  ;;  %v430_v50 = vld [vmem:[%s2328_s28 + $0x20] sm:$0xff] }
  0x27   : > { %v649_v22 = vfloor.f32 %v633_v16  ;;  %v446_v51 = vld [vmem:[%s2334_s11 + $0x20] sm:$0xff]  ;;  %v432_v62 = vld [vmem:[%s2328_s28 + $0x30] sm:$0xff] }
  0x28   : > { %1846 = vmatpush3.bf16.msra.mxu0 %v1996_v40  ;;  %v660_v9 = vmul.f32 0.01, %v644_v7  ;;  %v427_v40 = vld [vmem:[%s2328_s28 + $0x8] sm:$0xff]  ;;  %v2365_v59 = vsub.f32 %v446_v51, %v430_v50  ;;  %v448_v63 = vld [vmem:[%s2334_s11 + $0x30] sm:$0xff] }
  0x29   : > { %1847 = vmatprep.subr.bf16.mxu0 %v1997_v47  ;;  %v2377_v7 = vsub.f32 %v448_v63, %v432_v62 }
  0x2a   : > { %717 = vrot.lane.b32.xlu1 %v475_v13, %s2080_s20  ;;  %715 = vrot.lane.b32.xlu0 %v474_v14, %s2080_s20  ;;  %v486_v13 = vld [vmem:[%s2221_s18 + $0x60] sm:$0xff]  ;;  %v647_v14 = vfloor.f32 %v631_v10 }
  0x2c   : > { %1848 = vmatpush3.bf16.msra.mxu0 %v1997_v47  ;;  %v2355_v47 = vsub.f32 %v443_v41, %v427_v40 }
  0x2e   : > { %721 = vrot.lane.b32.xlu1 %v477_v20, %s2080_s20  ;;  %719 = vrot.lane.b32.xlu0 %v476_v21, %s2080_s20  ;;  %v663_v20 = vmul.f32 0.01, %v647_v14  ;;  %v662_v21 = vmul.f32 0.01, %v646_v15 }
  0x32   : > { %798 = vrot.lane.b32.xlu1 %v651_v26, %s2081_s21  ;;  %796 = vrot.lane.b32.xlu0 %v650_v24, %s2081_s21  ;;  %v665_v24 = vmul.f32 0.01, %v649_v22  ;;  %v1998_v26 = vld [vmem:[%s2664_s6] sm:$0xff]   ;;  %v435_v22 = vld [vmem:[%s2328_s28 + $0x48] sm:$0xff] }
  0x33   : > { %1865 = vmatprep.subr.bf16.mxu1 %v1998_v26 }
  0x34   : > { %1866 = vmatpush3.bf16.msra.mxu1 %v1998_v26 }
  0x35   : > { %1867 = vmatprep.subr.bf16.mxu1 %v1999_v27 }
  0x36   : > { %802 = vrot.lane.b32.xlu1 %v653_v28, %s2081_s21  ;;  %800 = vrot.lane.b32.xlu0 %v652_v23, %s2081_s21  ;;  %v648_v23 = vfloor.f32 %v632_v17  ;;  %v2000_v28 = vld [vmem:[%s2664_s6 + $0x10] sm:$0xff]  }
  0x38   : > { %v664_v25 = vmul.f32 0.01, %v648_v23  ;;  %1868 = vmatpush3.bf16.msra.mxu1 %v1999_v27  ;;  %v451_v23 = vld [vmem:[%s2334_s11 + $0x48] sm:$0xff] }
  0x39   : > { %1869 = vmatprep.subr.bf16.mxu1 %v2000_v28 }
  0x3a   : > { %553 = vperm.xlu1 %1989, %v467_v30   ;;  %548 = vperm.xlu0 %1988, %v466_v31   ;;  %v2002_v30 = vld [vmem:[%s2664_s6 + $0x20] sm:$0xff]   ;;  %v2003_v31 = vld [vmem:[%s2664_s6 + $0x28] sm:$0xff]  }
  0x3c   : > { %1870 = vmatpush3.bf16.msra.mxu1 %v2000_v28  ;;  %v2399_v28 = vsub.f32 %v451_v23, %v435_v22 }
  0x3d   : > { %1871 = vmatprep.subr.bf16.mxu1 %v2001_v29 }
  0x3e   : > { %563 = vperm.xlu1 %1989, %v469_v33   ;;  %558 = vperm.xlu0 %1988, %v468_v34   ;;  %v444_v33 = vld [vmem:[%s2334_s11 + $0x10] sm:$0xff]  ;;  %v426_v34 = vld [vmem:[%s2328_s28] sm:$0xff] }
  0x3f   : > { %v2343_v36 = vsub.f32 %v444_v33, %v428_v32  ;;  %v2345_v37 = vsub.f32 %v442_v35, %v426_v34  ;;  %v452_v33 = vld [vmem:[%s2334_s11 + $0x50] sm:$0xff] }
  0x40   : > { %1872 = vmatpush3.bf16.msra.mxu1 %v2001_v29 }
  0x41   : > { %1873 = vmatprep.subr.bf16.mxu1 %v2002_v30 }
  0x42   : > { %725 = vrot.lane.b32.xlu1 %v479_v38, %s2080_s20  ;;  %723 = vrot.lane.b32.xlu0 %v478_v39, %s2080_s20  ;;  %v429_v38 = vld [vmem:[%s2328_s28 + $0x18] sm:$0xff] }
  0x43   : > { %v445_v39 = vld [vmem:[%s2334_s11 + $0x18] sm:$0xff] }
  0x44   : > { %1874 = vmatpush3.bf16.msra.mxu1 %v2002_v30  ;;  %v437_v30 = vld [vmem:[%s2328_s28 + $0x58] sm:$0xff] }
  0x45   : > { %1875 = vmatprep.subr.bf16.mxu1 %v2003_v31 }
  0x46   : > { %729 = vrot.lane.b32.xlu1 %v481_v45, %s2080_s20  ;;  %727 = vrot.lane.b32.xlu0 %v480_v46, %s2080_s20  ;;  %v2353_v46 = vsub.f32 %v445_v39, %v429_v38 }
  0x48   : > { %1876 = vmatpush3.bf16.msra.mxu1 %v2003_v31  ;;  %v453_v31 = vld [vmem:[%s2334_s11 + $0x58] sm:$0xff] }
  0x4a   : > { %806 = vrot.lane.b32.xlu1 %v655_v48, %s2081_s21  ;;  %804 = vrot.lane.b32.xlu0 %v654_v49, %s2081_s21  ;;  %v431_v48 = vld [vmem:[%s2328_s28 + $0x28] sm:$0xff] }
  0x4b   : > { %v447_v49 = vld [vmem:[%s2334_s11 + $0x28] sm:$0xff] }
  0x4c   : > { %v2363_v58 = vsub.f32 %v447_v49, %v431_v48 }
  0x4e   : > { %810 = vrot.lane.b32.xlu1 %v657_v52, %s2081_s21  ;;  %808 = vrot.lane.b32.xlu0 %v656_v53, %s2081_s21 }
  0x52   : > { %573 = vperm.xlu1 %1989, %v471_v54   ;;  %568 = vperm.xlu0 %1988, %v470_v55  }
  0x56   : > { %583 = vperm.xlu1 %1989, %v473_v56   ;;  %578 = vperm.xlu0 %1988, %v472_v57  }
  0x5a   : > { %733 = vrot.lane.b32.xlu1 %v483_v60, %s2080_s20  ;;  %731 = vrot.lane.b32.xlu0 %v482_v61, %s2080_s20  ;;  %v433_v60 = vld [vmem:[%s2328_s28 + $0x38] sm:$0xff] }
  0x5b   : > { %v449_v61 = vld [vmem:[%s2334_s11 + $0x38] sm:$0xff] }
  0x5c   : > { %v2375_v6 = vsub.f32 %v449_v61, %v433_v60 }
  0x5e   : > { %737 = vrot.lane.b32.xlu1 %v485_v2, %s2080_s20  ;;  %735 = vrot.lane.b32.xlu0 %v484_v3, %s2080_s20 }
  0x62   : > { %814 = vrot.lane.b32.xlu1 %v659_v4, %s2081_s21  ;;  %812 = vrot.lane.b32.xlu0 %v658_v5, %s2081_s21 }
  0x66   : > { %818 = vrot.lane.b32.xlu1 %v661_v8, %s2081_s21  ;;  %816 = vrot.lane.b32.xlu0 %v660_v9, %s2081_s21 }
  0x6a   : > { %741 = vrot.lane.b32.xlu1 %v487_v12, %s2080_s20  ;;  %739 = vrot.lane.b32.xlu0 %v486_v13, %s2080_s20 }
  0x6e   : > { %745 = vrot.lane.b32.xlu1 %v489_v18, %s2080_s20  ;;  %743 = vrot.lane.b32.xlu0 %v488_v19, %s2080_s20 }
  0x72   : > { %822 = vrot.lane.b32.xlu1 %v663_v20, %s2081_s21  ;;  %820 = vrot.lane.b32.xlu0 %v662_v21, %s2081_s21 }
  0x76   : > { %826 = vrot.lane.b32.xlu1 %v665_v24, %s2081_s21  ;;  %824 = vrot.lane.b32.xlu0 %v664_v25, %s2081_s21  ;;  %v434_v24 = vld [vmem:[%s2328_s28 + $0x40] sm:$0xff] }
  0x77   : > { %v450_v25 = vld [vmem:[%s2334_s11 + $0x40] sm:$0xff] }
  0x78   : > { %v2401_v29 = vsub.f32 %v450_v25, %v434_v24 }
  0x99   : > { %v519_v42 = vpop.permute.xlu1 %518  ;;  %v509_v43 = vpop.permute.xlu0 %508 }
  0x9a   : > { %v588_v44 = vmul.f32 %v519_v42, %v2343_v36  ;;  %v586_v45 = vmul.f32 %v509_v43, %v2345_v37 }
  0x9c   : > { %v604_v52 = vadd.f32 %v588_v44, %v428_v32  ;;  %v602_v53 = vadd.f32 %v586_v45, %v426_v34  ;;  %v436_v32 = vld [vmem:[%s2328_s28 + $0x50] sm:$0xff] }
  0x9d   : > { %v524_v54 = vpop.permute.xlu1 %523  ;;  %v514_v55 = vpop.permute.xlu0 %513  ;;  %v2411_v44 = vsub.f32 %v452_v33, %v436_v32 }
  0x9e   : > { %v589_v56 = vmul.f32 %v524_v54, %v2353_v46  ;;  %v587_v57 = vmul.f32 %v514_v55, %v2355_v47  ;;  %683 = vst.msk [vmem:[#allocation2] sm:$0xff] %vm682_vm0, %v602_v53  ;;  %685 = vst.msk [vmem:[#allocation2 + $0x10] sm:$0xff] %vm682_vm0, %v604_v52 }
  0xa0   : > { %v605_v0 = vadd.f32 %v589_v56, %v429_v38  ;;  %v603_v1 = vadd.f32 %v587_v57, %v427_v40  ;;  %v2407_v40 = vsub.f32 %v453_v31, %v437_v30 }
  0xa1   : > { %v534_v2 = vpop.permute.xlu1 %533  ;;  %v529_v3 = vpop.permute.xlu0 %528 }
  0xa2   : > { %v591_v4 = vmul.f32 %v534_v2, %v2363_v58  ;;  %v590_v5 = vmul.f32 %v529_v3, %v2365_v59  ;;  %684 = vst.msk [vmem:[#allocation2 + $0x8] sm:$0xff] %vm682_vm0, %v603_v1  ;;  %686 = vst.msk [vmem:[#allocation2 + $0x18] sm:$0xff] %vm682_vm0, %v605_v0  ;;  %v439_v2 = vld [vmem:[%s2328_s28 + $0x68] sm:$0xff] }
  0xa3   : > { %v455_v3 = vld [vmem:[%s2334_s11 + $0x68] sm:$0xff] }
  0xa4   : > { %v607_v8 = vadd.f32 %v591_v4, %v431_v48  ;;  %v606_v9 = vadd.f32 %v590_v5, %v430_v50  ;;  %v438_v4 = vld [vmem:[%s2328_s28 + $0x60] sm:$0xff] }
  0xa5   : > { %v544_v10 = vpop.permute.xlu1 %543  ;;  %v539_v11 = vpop.permute.xlu0 %538  ;;  %v454_v5 = vld [vmem:[%s2334_s11 + $0x60] sm:$0xff] }
  0xa6   : > { %v593_v12 = vmul.f32 %v544_v10, %v2375_v6  ;;  %v592_v13 = vmul.f32 %v539_v11, %v2377_v7  ;;  %687 = vst.msk [vmem:[#allocation2 + $0x20] sm:$0xff] %vm682_vm0, %v606_v9  ;;  %688 = vst.msk [vmem:[#allocation2 + $0x28] sm:$0xff] %vm682_vm0, %v607_v8  ;;  %v2431_v10 = vsub.f32 %v455_v3, %v439_v2 }
  0xa7   : > { %v2433_v11 = vsub.f32 %v454_v5, %v438_v4 }
  0xa8   : > { %v609_v14 = vadd.f32 %v593_v12, %v433_v60  ;;  %v608_v15 = vadd.f32 %v592_v13, %v432_v62  ;;  %v441_v12 = vld [vmem:[%s2328_s28 + $0x78] sm:$0xff] }
  0xa9   : > { %v718_v16 = vpop.permute.xlu1 %717  ;;  %v716_v17 = vpop.permute.xlu0 %715  ;;  %v457_v13 = vld [vmem:[%s2334_s11 + $0x78] sm:$0xff] }
  0xaa   : > { %765 = vst.msk [vmem:[#allocation2 + $0x8] sm:$0xff] %vm763_vm1, %v718_v16  ;;  %764 = vst.msk [vmem:[#allocation2] sm:$0xff] %vm763_vm1, %v716_v17 }
  0xab   : > { %689 = vst.msk [vmem:[#allocation2 + $0x30] sm:$0xff] %vm682_vm0, %v608_v15  ;;  %690 = vst.msk [vmem:[#allocation2 + $0x38] sm:$0xff] %vm682_vm0, %v609_v14  ;;  %v440_v14 = vld [vmem:[%s2328_s28 + $0x70] sm:$0xff]  ;;  %s1781_s28 = sshll.u32 %s2159_s17, 7  ;;  %s399_s17 = sand.u32 1, %s2068_s14  }
  0xac   : > { %v456_v15 = vld [vmem:[%s2334_s11 + $0x70] sm:$0xff]  ;;  %s400_s11 = scalar_lea.vmem [#allocation3], %s399_s17  ;;  %s1639_s18 = scalar_lea.sflag [#allocation4], %s399_s17 }
  0xad   : > { %v722_v18 = vpop.permute.xlu1 %721  ;;  %v720_v19 = vpop.permute.xlu0 %719  ;;  %s1651_s12 = sshll.u32 %s400_s11, 4  ;;  %s2618_s12 = int_to_ptr.vmem [resolvable:$true] %s1651_s12 }
  0xae   : > { %767 = vst.msk [vmem:[#allocation2 + $0x18] sm:$0xff] %vm763_vm1, %v722_v18  ;;  %766 = vst.msk [vmem:[#allocation2 + $0x10] sm:$0xff] %vm763_vm1, %v720_v19  ;;  %s2014_s26 = scalar_lea.vmem %s2618_s12, 16 }
  0xaf   : > { %p2015_p11 = scmp.ne.s32.totalorder %s2618_s12, %s2014_s26 }
  0xb1   : > { %v799_v20 = vpop.permute.xlu1 %798  ;;  %v797_v21 = vpop.permute.xlu0 %796  ;;  %p2016_p12 = pnand %p2015_p11, %p2176_p5 }
  0xb2   : > { %846 = vst.msk [vmem:[#allocation2 + $0x8] sm:$0xff] %vm844_vm2, %v799_v20  ;;  %845 = vst.msk [vmem:[#allocation2] sm:$0xff] %vm844_vm2, %v797_v21  ;;  %v2439_v20 = vsub.f32 %v457_v13, %v441_v12 }
  0xb3   : > { %p2017_p13 = pneg %p2016_p12 }
  0xb5   : > { %v803_v26 = vpop.permute.xlu1 %802  ;;  %v801_v27 = vpop.permute.xlu0 %800 }
  0xb6   : > { %848 = vst.msk [vmem:[#allocation2 + $0x18] sm:$0xff] %vm844_vm2, %v803_v26  ;;  %847 = vst.msk [vmem:[#allocation2 + $0x10] sm:$0xff] %vm844_vm2, %v801_v27 }
  0xb9   : > { %v554_v34 = vpop.permute.xlu1 %553  ;;  %v549_v35 = vpop.permute.xlu0 %548  ;;  %v861_v38 = vld [vmem:[#allocation2] sm:$0xff]  ;;  %v862_v39 = vld [vmem:[#allocation2 + $0x8] sm:$0xff] }
  0xba   : > { %v595_v41 = vmul.f32 %v554_v34, %v2399_v28  ;;  %v594_v42 = vmul.f32 %v549_v35, %v2401_v29  ;;  %v877_v43 = vpack.c.bf16 %v862_v39, %v861_v38 }
  0xbc   : > { %v611_v45 = vadd.f32 %v595_v41, %v435_v22  ;;  %v610_v48 = vadd.f32 %v594_v42, %v434_v24  ;;  %1849 = vmatprep.mubr.bf16.mxu0 %v877_v43  ;;  %v2443_v24 = vsub.f32 %v456_v15, %v440_v14  ;;  %v2005_v15 = vld [vmem:[%s2664_s6 + $0x38] sm:$0xff]  }
  0xbd   : > { %v564_v49 = vpop.permute.xlu1 %563  ;;  %v559_v50 = vpop.permute.xlu0 %558  ;;  %v863_v51 = vld [vmem:[#allocation2 + $0x10] sm:$0xff]  ;;  %v864_v52 = vld [vmem:[#allocation2 + $0x18] sm:$0xff] }
  0xbe   : > { %692 = vst.msk [vmem:[#allocation2 + $0x48] sm:$0xff] %vm682_vm0, %v611_v45  ;;  %691 = vst.msk [vmem:[#allocation2 + $0x40] sm:$0xff] %vm682_vm0, %v610_v48  ;;  %v597_v53 = vmul.f32 %v564_v49, %v2407_v40  ;;  %v596_v54 = vmul.f32 %v559_v50, %v2411_v44  ;;  %v878_v55 = vpack.c.bf16 %v864_v52, %v863_v51 }
  0xc0   : > { %v613_v56 = vadd.f32 %v597_v53, %v437_v30  ;;  %v612_v57 = vadd.f32 %v596_v54, %v436_v32  ;;  %1850 = vmatmul.mubr.bf16.vlgmr.msra.gmra.mrb[0].mxu0 %v878_v55 }
  0xc1   : > { %v726_v60 = vpop.permute.xlu1 %725  ;;  %v724_v61 = vpop.permute.xlu0 %723 }
  0xc2   : > { %694 = vst.msk [vmem:[#allocation2 + $0x58] sm:$0xff] %vm682_vm0, %v613_v56  ;;  %693 = vst.msk [vmem:[#allocation2 + $0x50] sm:$0xff] %vm682_vm0, %v612_v57 }
  0xc3   : > { %769 = vst.msk [vmem:[#allocation2 + $0x28] sm:$0xff] %vm763_vm1, %v726_v60  ;;  %768 = vst.msk [vmem:[#allocation2 + $0x20] sm:$0xff] %vm763_vm1, %v724_v61 }
  0xc5   : > { %v730_v62 = vpop.permute.xlu1 %729  ;;  %v728_v63 = vpop.permute.xlu0 %727 }
  0xc6   : > { %771 = vst.msk [vmem:[#allocation2 + $0x38] sm:$0xff] %vm763_vm1, %v730_v62  ;;  %770 = vst.msk [vmem:[#allocation2 + $0x30] sm:$0xff] %vm763_vm1, %v728_v63 }
  0xc9   : > { %v807_v0 = vpop.permute.xlu1 %806  ;;  %v805_v1 = vpop.permute.xlu0 %804 }
  0xca   : > { %850 = vst.msk [vmem:[#allocation2 + $0x28] sm:$0xff] %vm844_vm2, %v807_v0  ;;  %849 = vst.msk [vmem:[#allocation2 + $0x20] sm:$0xff] %vm844_vm2, %v805_v1 }
  0xcd   : > { %v811_v8 = vpop.permute.xlu1 %810  ;;  %v809_v9 = vpop.permute.xlu0 %808 }
  0xce   : > { %852 = vst.msk [vmem:[#allocation2 + $0x38] sm:$0xff] %vm844_vm2, %v811_v8  ;;  %851 = vst.msk [vmem:[#allocation2 + $0x30] sm:$0xff] %vm844_vm2, %v809_v9 }
  0xd1   : > { %v574_v16 = vpop.permute.xlu1 %573  ;;  %v569_v17 = vpop.permute.xlu0 %568  ;;  %v865_v18 = vld [vmem:[#allocation2 + $0x20] sm:$0xff]  ;;  %v866_v19 = vld [vmem:[#allocation2 + $0x28] sm:$0xff] }
  0xd2   : > { %v599_v21 = vmul.f32 %v574_v16, %v2431_v10  ;;  %v598_v22 = vmul.f32 %v569_v17, %v2433_v11  ;;  %v879_v23 = vpack.c.bf16 %v866_v19, %v865_v18  ;;  %v2006_v16 = vld [vmem:[%s2666_s8] sm:$0xff]   ;;  %v2007_v17 = vld [vmem:[%s2666_s8 + $0x8] sm:$0xff]   ;;  %v2008_v18 = vld [vmem:[%s2666_s8 + $0x10] sm:$0xff]  }
  0xd3   : > { %1897 = vmatprep.subr.bf16.mxu0 %v2006_v16  ;;  %v2009_v19 = vld [vmem:[%s2666_s8 + $0x18] sm:$0xff]  }
  0xd4   : > { %v615_v25 = vadd.f32 %v599_v21, %v439_v2  ;;  %v614_v26 = vadd.f32 %v598_v22, %v438_v4  ;;  %1853 = vmatprep.mubr.bf16.mxu0 %v879_v23  ;;  %1898 = vmatpush3.bf16.msra.mxu0 %v2006_v16  ;;  %v2010_v21 = vld [vmem:[%s2666_s8 + $0x20] sm:$0xff]   ;;  %v2011_v22 = vld [vmem:[%s2666_s8 + $0x28] sm:$0xff]  }
  0xd5   : > { %v584_v27 = vpop.permute.xlu1 %583  ;;  %v579_v30 = vpop.permute.xlu0 %578  ;;  %v867_v31 = vld [vmem:[#allocation2 + $0x30] sm:$0xff]  ;;  %v868_v32 = vld [vmem:[#allocation2 + $0x38] sm:$0xff]  ;;  %1899 = vmatprep.subr.bf16.mxu0 %v2007_v17  ;;  %v2494_v23 = vld [vmem:[%s2663_s5] ss:$0 sm:$0xff] }
  0xd6   : > { %696 = vst.msk [vmem:[#allocation2 + $0x68] sm:$0xff] %vm682_vm0, %v615_v25  ;;  %695 = vst.msk [vmem:[#allocation2 + $0x60] sm:$0xff] %vm682_vm0, %v614_v26  ;;  %v601_v33 = vmul.f32 %v584_v27, %v2439_v20  ;;  %v600_v34 = vmul.f32 %v579_v30, %v2443_v24  ;;  %v880_v35 = vpack.c.bf16 %v868_v32, %v867_v31 }
  0xd8   : > { %v617_v38 = vadd.f32 %v601_v33, %v441_v12  ;;  %v616_v39 = vadd.f32 %v600_v34, %v440_v14  ;;  %1854 = vmatmul.mubr.bf16.gmra.mrb[4].mxu0 %v880_v35  ;;  %v2004_v14 = vld [vmem:[%s2664_s6 + $0x30] sm:$0xff]  }
  0xd9   : > { %v734_v41 = vpop.permute.xlu1 %733  ;;  %v732_v42 = vpop.permute.xlu0 %731  ;;  %1877 = vmatprep.subr.bf16.mxu1 %v2004_v14  ;;  %1900 = vmatpush3.bf16.msra.mxu0 %v2007_v17 }
  0xda   : > { %698 = vst.msk [vmem:[#allocation2 + $0x78] sm:$0xff] %vm682_vm0, %v617_v38  ;;  %697 = vst.msk [vmem:[#allocation2 + $0x70] sm:$0xff] %vm682_vm0, %v616_v39  ;;  %1878 = vmatpush3.bf16.msra.mxu1 %v2004_v14  ;;  %1901 = vmatprep.subr.bf16.mxu0 %v2008_v18 }
  0xdb   : > { %773 = vst.msk [vmem:[#allocation2 + $0x48] sm:$0xff] %vm763_vm1, %v734_v41  ;;  %772 = vst.msk [vmem:[#allocation2 + $0x40] sm:$0xff] %vm763_vm1, %v732_v42  ;;  %1879 = vmatprep.subr.bf16.mxu1 %v2005_v15 }
  0xdd   : > { %v738_v43 = vpop.permute.xlu1 %737  ;;  %v736_v45 = vpop.permute.xlu0 %735  ;;  %1902 = vmatpush3.bf16.msra.mxu0 %v2008_v18 }
  0xde   : > { %775 = vst.msk [vmem:[#allocation2 + $0x58] sm:$0xff] %vm763_vm1, %v738_v43  ;;  %774 = vst.msk [vmem:[#allocation2 + $0x50] sm:$0xff] %vm763_vm1, %v736_v45  ;;  %1880 = vmatpush3.bf16.msra.mxu1 %v2005_v15  ;;  %1903 = vmatprep.subr.bf16.mxu0 %v2009_v19 }
  0xdf   : > { %1929 = vmatprep.subr.bf16.mxu1 %v2006_v16 }
  0xe1   : > { %v815_v48 = vpop.permute.xlu1 %814  ;;  %v813_v49 = vpop.permute.xlu0 %812  ;;  %1904 = vmatpush3.bf16.msra.mxu0 %v2009_v19 }
  0xe2   : > { %854 = vst.msk [vmem:[#allocation2 + $0x48] sm:$0xff] %vm844_vm2, %v815_v48  ;;  %853 = vst.msk [vmem:[#allocation2 + $0x40] sm:$0xff] %vm844_vm2, %v813_v49  ;;  %1905 = vmatprep.subr.bf16.mxu0 %v2010_v21 }
  0xe5   : > { %v819_v50 = vpop.permute.xlu1 %818  ;;  %v817_v51 = vpop.permute.xlu0 %816  ;;  %1906 = vmatpush3.bf16.msra.mxu0 %v2010_v21 }
  0xe6   : > { %856 = vst.msk [vmem:[#allocation2 + $0x58] sm:$0xff] %vm844_vm2, %v819_v50  ;;  %855 = vst.msk [vmem:[#allocation2 + $0x50] sm:$0xff] %vm844_vm2, %v817_v51  ;;  %1907 = vmatprep.subr.bf16.mxu0 %v2011_v22 }
  0xe9   : > { %v742_v52 = vpop.permute.xlu1 %741  ;;  %v740_v53 = vpop.permute.xlu0 %739  ;;  %v869_v54 = vld [vmem:[#allocation2 + $0x40] sm:$0xff]  ;;  %v870_v55 = vld [vmem:[#allocation2 + $0x48] sm:$0xff]  ;;  %1908 = vmatpush3.bf16.msra.mxu0 %v2011_v22 }
  0xea   : > { %777 = vst.msk [vmem:[#allocation2 + $0x68] sm:$0xff] %vm763_vm1, %v742_v52  ;;  %776 = vst.msk [vmem:[#allocation2 + $0x60] sm:$0xff] %vm763_vm1, %v740_v53  ;;  %v881_v56 = vpack.c.bf16 %v870_v55, %v869_v54 }
  0xec   : > { %1857 = vmatprep.mubr.bf16.mxu0 %v881_v56 }
  0xed   : > { %v746_v57 = vpop.permute.xlu1 %745  ;;  %v744_v60 = vpop.permute.xlu0 %743  ;;  %v871_v61 = vld [vmem:[#allocation2 + $0x50] sm:$0xff]  ;;  %v872_v62 = vld [vmem:[#allocation2 + $0x58] sm:$0xff] }
  0xee   : > { %779 = vst.msk [vmem:[#allocation2 + $0x78] sm:$0xff] %vm763_vm1, %v746_v57  ;;  %778 = vst.msk [vmem:[#allocation2 + $0x70] sm:$0xff] %vm763_vm1, %v744_v60  ;;  %v882_v63 = vpack.c.bf16 %v872_v62, %v871_v61 }
  0xf0   : > { %1858 = vmatmul.mubr.bf16.gmra.mrb[8].mxu0 %v882_v63 }
  0xf1   : > { %v823_v0 = vpop.permute.xlu1 %822  ;;  %v821_v1 = vpop.permute.xlu0 %820 }
  0xf2   : > { %858 = vst.msk [vmem:[#allocation2 + $0x68] sm:$0xff] %vm844_vm2, %v823_v0  ;;  %857 = vst.msk [vmem:[#allocation2 + $0x60] sm:$0xff] %vm844_vm2, %v821_v1 }
  0xf5   : > { %v827_v2 = vpop.permute.xlu1 %826  ;;  %v825_v3 = vpop.permute.xlu0 %824 }
  0xf6   : > { %860 = vst.msk [vmem:[#allocation2 + $0x78] sm:$0xff] %vm844_vm2, %v827_v2  ;;  %859 = vst.msk [vmem:[#allocation2 + $0x70] sm:$0xff] %vm844_vm2, %v825_v3 }
  0xf9   : > { %v873_v4 = vld [vmem:[#allocation2 + $0x60] sm:$0xff]  ;;  %v874_v5 = vld [vmem:[#allocation2 + $0x68] sm:$0xff] }
  0xfa   : > { %v883_v8 = vpack.c.bf16 %v874_v5, %v873_v4 }
  0xfc   : > { %1861 = vmatprep.mubr.bf16.mxu0 %v883_v8 }
  0xfd   : > { %v875_v9 = vld [vmem:[#allocation2 + $0x70] sm:$0xff]  ;;  %v876_v12 = vld [vmem:[#allocation2 + $0x78] sm:$0xff] }
  0xfe   : > { %v884_v13 = vpack.c.bf16 %v876_v12, %v875_v9 }
 0x100   : > { %1862 = vmatmul.mubr.bf16.gmra.mrb[12].mxu0 %v884_v13 }
 0x193   : > { %v1851_v25 = vpop.f32.mrb[0].mxu0 }
 0x194   : > { %v999_v26 = vadd.f32 %v1851_v25, %v2494_v23  ;;  %v990_v27 = vpop.f32.mrb[1].mxu0 }
 0x195   : > { %v991_v30 = vadd.f32 %v2494_v23, %v990_v27  ;;  %v1852_v31 = vpop.f32.mrb[2].mxu0 }
 0x196   : > { %v1002_v32 = vadd.f32 %v1852_v31, %v2494_v23  ;;  %v993_v33 = vpop.f32.mrb[3].mxu0  ;;  %v1055_v35 = vmax.f32 %v999_v26, 0.0 }
 0x197   : > { %v994_v34 = vadd.f32 %v2494_v23, %v993_v33  ;;  %v1053_v39 = vmax.f32 %v991_v30, 0.0 }
 0x198   : > { %v1056_v38 = vmax.f32 %v1002_v32, 0.0 }
 0x199   : > { %v1054_v41 = vmax.f32 %v994_v34, 0.0 }
 0x19a   : > { %v1070_v42 = vpack.c.bf16 %v1056_v38, %v1055_v35  ;;  %v2012_v38 = vld [vmem:[%s2666_s8 + $0x30] sm:$0xff]  }
 0x19b   : > { %v1069_v43 = vpack.c.bf16 %v1054_v41, %v1053_v39  ;;  %1909 = vmatprep.subr.bf16.mxu0 %v2012_v38  ;;  %v1763_v39 = vld [vmem:[%s2665_s7] ss:$0 sm:$0xff] }
 0x19c   : > { %1910 = vmatpush3.bf16.msra.mxu0 %v2012_v38 }
 0x19d   : > { %1881 = vmatprep.mubr.bf16.mxu1 %v1069_v43 }
 0x19e   : > { %1882 = vmatmul.mubr.bf16.vlgmr.msra.gmra.mrb[0].mxu1 %v1070_v42 }
 0x19f   : > { %1937 = vmatpush3.bf16.msra.mxu1 %v2006_v16 }
 0x1a0   : > { %1930 = vmatprep.subr.bf16.mxu1 %v2007_v17 }
 0x1a3   : > { %1938 = vmatpush3.bf16.msra.mxu1 %v2007_v17 }
 0x1a4   : > { %1931 = vmatprep.subr.bf16.mxu1 %v2008_v18 }
 0x1a7   : > { %1939 = vmatpush3.bf16.msra.mxu1 %v2008_v18 }
 0x1a8   : > { %1932 = vmatprep.subr.bf16.mxu1 %v2009_v19 }
 0x1ab   : > { %v1855_v45 = vpop.f32.mrb[4].mxu0  ;;  %1940 = vmatpush3.bf16.msra.mxu1 %v2009_v19 }
 0x1ac   : > { %v1015_v48 = vadd.f32 %v1855_v45, %v2494_v23  ;;  %v1006_v49 = vpop.f32.mrb[5].mxu0  ;;  %1933 = vmatprep.subr.bf16.mxu1 %v2010_v21 }
 0x1ad   : > { %v1007_v50 = vadd.f32 %v2494_v23, %v1006_v49  ;;  %v1856_v51 = vpop.f32.mrb[6].mxu0 }
 0x1ae   : > { %v1018_v52 = vadd.f32 %v1856_v51, %v2494_v23  ;;  %v1009_v53 = vpop.f32.mrb[7].mxu0  ;;  %v1059_v55 = vmax.f32 %v1015_v48, 0.0 }
 0x1af   : > { %v1010_v54 = vadd.f32 %v2494_v23, %v1009_v53  ;;  %1941 = vmatpush3.bf16.msra.mxu1 %v2010_v21  ;;  %v1057_v57 = vmax.f32 %v1007_v50, 0.0 }
 0x1b0   : > { %v1060_v56 = vmax.f32 %v1018_v52, 0.0  ;;  %1934 = vmatprep.subr.bf16.mxu1 %v2011_v22 }
 0x1b1   : > { %v1058_v60 = vmax.f32 %v1010_v54, 0.0 }
 0x1b2   : > { %v1072_v61 = vpack.c.bf16 %v1060_v56, %v1059_v55 }
 0x1b3   : > { %v1071_v62 = vpack.c.bf16 %v1058_v60, %v1057_v57  ;;  %1942 = vmatpush3.bf16.msra.mxu1 %v2011_v22 }
 0x1b4   : > { %1935 = vmatprep.subr.bf16.mxu1 %v2012_v38 }
 0x1b5   : > { %1885 = vmatprep.mubr.bf16.mxu1 %v1071_v62 }
 0x1b6   : > { %1886 = vmatmul.mubr.bf16.gmra.mrb[4].mxu1 %v1072_v61 }
 0x1b7   : > { %1943 = vmatpush3.bf16.msra.mxu1 %v2012_v38 }
 0x1c3   : > { %v1859_v63 = vpop.f32.mrb[8].mxu0 }
 0x1c4   : > { %v1031_v0 = vadd.f32 %v1859_v63, %v2494_v23  ;;  %v1022_v1 = vpop.f32.mrb[9].mxu0 }
 0x1c5   : > { %v1023_v2 = vadd.f32 %v2494_v23, %v1022_v1  ;;  %v1860_v3 = vpop.f32.mrb[10].mxu0 }
 0x1c6   : > { %v1034_v4 = vadd.f32 %v1860_v3, %v2494_v23  ;;  %v1025_v5 = vpop.f32.mrb[11].mxu0  ;;  %v1063_v9 = vmax.f32 %v1031_v0, 0.0 }
 0x1c7   : > { %v1026_v8 = vadd.f32 %v2494_v23, %v1025_v5  ;;  %v1061_v13 = vmax.f32 %v1023_v2, 0.0 }
 0x1c8   : > { %v1064_v12 = vmax.f32 %v1034_v4, 0.0 }
 0x1c9   : > { %v1062_v14 = vmax.f32 %v1026_v8, 0.0 }
 0x1ca   : > { %v1074_v15 = vpack.c.bf16 %v1064_v12, %v1063_v9 }
 0x1cb   : > { %v1073_v16 = vpack.c.bf16 %v1062_v14, %v1061_v13 }
 0x1cd   : > { %1889 = vmatprep.mubr.bf16.mxu1 %v1073_v16 }
 0x1ce   : > { %1890 = vmatmul.mubr.bf16.gmra.mrb[8].mxu1 %v1074_v15 }
 0x1d3   : > { %v1863_v17 = vpop.f32.mrb[12].mxu0 }
 0x1d4   : > { %v1047_v18 = vadd.f32 %v1863_v17, %v2494_v23  ;;  %v1038_v19 = vpop.f32.mrb[13].mxu0 }
 0x1d5   : > { %v1039_v21 = vadd.f32 %v2494_v23, %v1038_v19  ;;  %v1864_v22 = vpop.f32.mrb[14].mxu0 }
 0x1d6   : > { %v1050_v25 = vadd.f32 %v1864_v22, %v2494_v23  ;;  %v1041_v26 = vpop.f32.mrb[15].mxu0  ;;  %v1067_v30 = vmax.f32 %v1047_v18, 0.0 }
 0x1d7   : > { %v1042_v27 = vadd.f32 %v2494_v23, %v1041_v26  ;;  %v1065_v32 = vmax.f32 %v1039_v21, 0.0  ;;  %v2013_v23 = vld [vmem:[%s2666_s8 + $0x38] sm:$0xff]  }
 0x1d8   : > { %v1068_v31 = vmax.f32 %v1050_v25, 0.0  ;;  %1911 = vmatprep.subr.bf16.mxu0 %v2013_v23  ;;  %1936 = vmatprep.subr.bf16.mxu1 %v2013_v23 }
 0x1d9   : > { %v1066_v33 = vmax.f32 %v1042_v27, 0.0  ;;  %1912 = vmatpush3.bf16.msra.mxu0 %v2013_v23  ;;  %1944 = vmatpush3.bf16.msra.mxu1 %v2013_v23 }
 0x1da   : > { %v1076_v34 = vpack.c.bf16 %v1068_v31, %v1067_v30 }
 0x1db   : > { %v1075_v35 = vpack.c.bf16 %v1066_v33, %v1065_v32 }
 0x1dd   : > { %1893 = vmatprep.mubr.bf16.mxu1 %v1075_v35 }
 0x1de   : > { %1894 = vmatmul.mubr.bf16.gmra.mrb[12].mxu1 %v1076_v34 }
 0x271   : > { %v1883_v41 = vpop.f32.mrb[0].mxu1 }
 0x272   : > { %v1191_v42 = vadd.f32 %v1883_v41, %v1763_v39  ;;  %v1182_v43 = vpop.f32.mrb[1].mxu1 }
 0x273   : > { %v1183_v45 = vadd.f32 %v1763_v39, %v1182_v43  ;;  %v1884_v48 = vpop.f32.mrb[2].mxu1 }
 0x274   : > { %v1194_v49 = vadd.f32 %v1884_v48, %v1763_v39  ;;  %v1185_v50 = vpop.f32.mrb[3].mxu1  ;;  %v1247_v52 = vmax.f32 %v1191_v42, 0.0 }
 0x275   : > { %v1186_v51 = vadd.f32 %v1763_v39, %v1185_v50  ;;  %v1245_v54 = vmax.f32 %v1183_v45, 0.0 }
 0x276   : > { %v1248_v53 = vmax.f32 %v1194_v49, 0.0 }
 0x277   : > { %v1246_v55 = vmax.f32 %v1186_v51, 0.0 }
 0x278   : > { %v1262_v56 = vpack.c.bf16 %v1248_v53, %v1247_v52  ;;  %v1470_v53 = vlaneseq }
 0x279   : > { %v1261_v57 = vpack.c.bf16 %v1246_v55, %v1245_v54  ;;  %v2527_v55 = vld [vmem:[%s2667_s9] ss:$0 sm:$0xff] }
 0x27a   : > { %v2521_v54 = vshrl.u32 %v1470_v53, 7 }
 0x27b   : > { %1913 = vmatprep.mubr.bf16.mxu0 %v1261_v57 }
 0x27c   : > { %1914 = vmatmul.mubr.bf16.vlgmr.msra.gmra.mrb[16].mxu0 %v1262_v56  ;;  %v2529_v56 = vstv %s1781_s28  ;;  %v1472_v57 = vadd.s32 8, %v2521_v54  ;;  %s2082_s28 = smov [#allocation3]  }
 0x27d   : > { %s2018_s20 = sshll.u32 %s2082_s28, 4  ;;  %s2019_s20 = int_to_ptr.vmem [resolvable:$false] %s2018_s20 }
 0x27e   : > { %s2020_s29 = scalar_lea.vmem %s2019_s20, 32  ;;  %p2021_p0 = scmp.lt.s32.totalorder %s2618_s12, %s2019_s20 }
 0x27f   : > { %p2022_p1 = scmp.lt.s32.totalorder %s2020_s29, %s2014_s26 }
 0x281   : > { %p2023_p2 = por %p2022_p1, %p2021_p0 }
 0x283   : > { %p2024_p3 = pnand %p2023_p2, %p2017_p13 }
 0x289   : > { %v1887_v60 = vpop.f32.mrb[4].mxu1 }
 0x28a   : > { %v1207_v61 = vadd.f32 %v1887_v60, %v1763_v39  ;;  %v1198_v62 = vpop.f32.mrb[5].mxu1 }
 0x28b   : > { %v1199_v63 = vadd.f32 %v1763_v39, %v1198_v62  ;;  %v1888_v0 = vpop.f32.mrb[6].mxu1 }
 0x28c   : > { %v1210_v1 = vadd.f32 %v1888_v0, %v1763_v39  ;;  %v1201_v2 = vpop.f32.mrb[7].mxu1  ;;  %v1251_v4 = vmax.f32 %v1207_v61, 0.0 }
 0x28d   : > { %v1202_v3 = vadd.f32 %v1763_v39, %v1201_v2  ;;  %v1249_v8 = vmax.f32 %v1199_v63, 0.0  ;;  %v1488_v63 = vadd.s32 %v2529_v56, %v2521_v54 }
 0x28e   : > { %v1252_v5 = vmax.f32 %v1210_v1, 0.0 }
 0x28f   : > { %v1250_v9 = vmax.f32 %v1202_v3, 0.0  ;;  %vm1504_vm3 = vcmp.lt.s32.totalorder %v1488_v63, 200 }
 0x290   : > { %v1264_v12 = vpack.c.bf16 %v1252_v5, %v1251_v4 }
 0x291   : > { %v1263_v13 = vpack.c.bf16 %v1250_v9, %v1249_v8  ;;  %v1489_v8 = vadd.s32 %v2529_v56, %v1472_v57  ;;  %v1474_v9 = vadd.s32 24, %v2521_v54 }
 0x293   : > { %1917 = vmatprep.mubr.bf16.mxu0 %v1263_v13  ;;  %vm1505_vm4 = vcmp.lt.s32.totalorder %v1489_v8, 200  ;;  %v1481_v8 = vadd.s32 80, %v2521_v54 }
 0x294   : > { %1918 = vmatmul.mubr.bf16.gmra.mrb[20].mxu0 %v1264_v12 }
 0x2a1   : > { %v1891_v14 = vpop.f32.mrb[8].mxu1 }
 0x2a2   : > { %v1223_v15 = vadd.f32 %v1891_v14, %v1763_v39  ;;  %v1214_v16 = vpop.f32.mrb[9].mxu1 }
 0x2a3   : > { %v1215_v17 = vadd.f32 %v1763_v39, %v1214_v16  ;;  %v1892_v18 = vpop.f32.mrb[10].mxu1 }
 0x2a4   : > { %v1226_v19 = vadd.f32 %v1892_v18, %v1763_v39  ;;  %v1217_v21 = vpop.f32.mrb[11].mxu1  ;;  %v1255_v25 = vmax.f32 %v1223_v15, 0.0 }
 0x2a5   : > { %v1218_v22 = vadd.f32 %v1763_v39, %v1217_v21  ;;  %v1253_v27 = vmax.f32 %v1215_v17, 0.0 }
 0x2a6   : > { %v1256_v26 = vmax.f32 %v1226_v19, 0.0 }
 0x2a7   : > { %v1254_v30 = vmax.f32 %v1218_v22, 0.0 }
 0x2a8   : > { %v1266_v31 = vpack.c.bf16 %v1256_v26, %v1255_v25 }
 0x2a9   : > { %v1265_v32 = vpack.c.bf16 %v1254_v30, %v1253_v27  ;;  %v1475_v30 = vadd.s32 32, %v2521_v54 }
 0x2ab   : > { %1921 = vmatprep.mubr.bf16.mxu1 %v1265_v32  ;;  %v1477_v32 = vadd.s32 48, %v2521_v54 }
 0x2ac   : > { %1922 = vmatmul.mubr.bf16.vlgmr.msra.gmra.mrb[16].mxu1 %v1266_v31  ;;  %v1476_v31 = vadd.s32 40, %v2521_v54 }
 0x2b1   : > { %v1895_v33 = vpop.f32.mrb[12].mxu1 }
 0x2b2   : > { %v1239_v34 = vadd.f32 %v1895_v33, %v1763_v39  ;;  %v1230_v35 = vpop.f32.mrb[13].mxu1 }
 0x2b3   : > { %v1231_v38 = vadd.f32 %v1763_v39, %v1230_v35  ;;  %v1896_v23 = vpop.f32.mrb[14].mxu1 }
 0x2b4   : > { %v1242_v41 = vadd.f32 %v1896_v23, %v1763_v39  ;;  %v1233_v42 = vpop.f32.mrb[15].mxu1  ;;  %v1259_v45 = vmax.f32 %v1239_v34, 0.0  ;;  %v1478_v23 = vadd.s32 56, %v2521_v54 }
 0x2b5   : > { %v1234_v43 = vadd.f32 %v1763_v39, %v1233_v42  ;;  %v1257_v49 = vmax.f32 %v1231_v38, 0.0  ;;  %v1473_v39 = vadd.s32 16, %v2521_v54  ;;  %v1492_v38 = vadd.s32 %v2529_v56, %v1475_v30 }
 0x2b6   : > { %v1260_v48 = vmax.f32 %v1242_v41, 0.0 }
 0x2b7   : > { %v1258_v50 = vmax.f32 %v1234_v43, 0.0  ;;  %v1490_v2 = vadd.s32 %v2529_v56, %v1473_v39  ;;  %vm1508_vm7 = vcmp.lt.s32.totalorder %v1492_v38, 200  ;;  %v1495_v39 = vadd.s32 %v2529_v56, %v1478_v23 }
 0x2b8   : > { %v1268_v51 = vpack.c.bf16 %v1260_v48, %v1259_v45  ;;  %v1483_v23 = vadd.s32 96, %v2521_v54 }
 0x2b9   : > { %v1267_v52 = vpack.c.bf16 %v1258_v50, %v1257_v49  ;;  %vm1506_vm5 = vcmp.lt.s32.totalorder %v1490_v2, 200  ;;  %v1493_v49 = vadd.s32 %v2529_v56, %v1476_v31  ;;  %v1494_v50 = vadd.s32 %v2529_v56, %v1477_v32 }
 0x2ba   : > { %vm1511_vm10 = vcmp.lt.s32.totalorder %v1495_v39, 200 }
 0x2bb   : > { %1925 = vmatprep.mubr.bf16.mxu1 %v1267_v52  ;;  %vm1509_vm8 = vcmp.lt.s32.totalorder %v1493_v49, 200  ;;  %vm1510_vm9 = vcmp.lt.s32.totalorder %v1494_v50, 200  ;;  %v1500_v49 = vadd.s32 %v2529_v56, %v1483_v23  ;;  %v1486_v50 = vadd.s32 120, %v2521_v54 }
 0x2bc   : > { %1926 = vmatmul.mubr.bf16.gmra.mrb[20].mxu1 %v1268_v51 }
 0x2bd   : > { %vm1516_vm15 = vcmp.lt.s32.totalorder %v1500_v49, 200 }
 0x34f   : > { %v1915_v60 = vpop.f32.mrb[16].mxu0 }
 0x350   : > { %v1383_v61 = vadd.f32 %v1915_v60, %v2527_v55  ;;  %v1374_v62 = vpop.f32.mrb[17].mxu0 }
 0x351   : > { %v1375_v0 = vadd.f32 %v2527_v55, %v1374_v62  ;;  %v1916_v1 = vpop.f32.mrb[18].mxu0 }
 0x352   : > { %v1439_v3 = vsub.f32 %v1383_v61, %v2343_v36  ;;  %v1386_v4 = vadd.f32 %v1916_v1, %v2527_v55  ;;  %v1377_v5 = vpop.f32.mrb[19].mxu0  ;;  %v1491_v36 = vadd.s32 %v2529_v56, %v1474_v9 }
 0x353   : > { %v1437_v12 = vsub.f32 %v1375_v0, %v2345_v37  ;;  %v1378_v13 = vadd.f32 %v2527_v55, %v1377_v5  ;;  %v1480_v5 = vadd.s32 72, %v2521_v54 }
 0x354   : > { %v1455_v14 = vmul.f32 %v1439_v3, %v1439_v3  ;;  %v1440_v16 = vsub.f32 %v1386_v4, %v2353_v46  ;;  %vm1507_vm6 = vcmp.lt.s32.totalorder %v1491_v36, 200  ;;  %v1479_v4 = vadd.s32 64, %v2521_v54 }
 0x355   : > { %v1453_v15 = vmul.f32 %v1437_v12, %v1437_v12  ;;  %v1438_v17 = vsub.f32 %v1378_v13, %v2355_v47 }
 0x356   : > { %v1456_v22 = vmul.f32 %v1440_v16, %v1440_v16  ;;  %v1554_v25 = vsel %vm1506_vm5, %v1455_v14, 0.0  ;;  %v1496_v14 = vadd.s32 %v2529_v56, %v1479_v4 }
 0x357   : > { %v1454_v18 = vmul.f32 %v1438_v17, %v1438_v17  ;;  %v1552_v19 = vsel %vm1504_vm3, %v1453_v15, 0.0  ;;  %v1574_v46 = vsel %vm682_vm0, %v1554_v25, 0.0  ;;  %v1482_v15 = vadd.s32 88, %v2521_v54 }
 0x358   : > { %v1568_v21 = vsel %vm682_vm0, %v1552_v19, 0.0  ;;  %v1555_v47 = vsel %vm1507_vm6, %v1456_v22, 0.0  ;;  %v1498_v22 = vadd.s32 %v2529_v56, %v1481_v8  ;;  %vm1512_vm11 = vcmp.lt.s32.totalorder %v1496_v14, 200 }
 0x359   : > { %1569 = vadd.xlane.f32.xlu0 %v1568_v21  ;;  %v1553_v37 = vsel %vm1505_vm4, %v1454_v18, 0.0  ;;  %v1577_v27 = vsel %vm682_vm0, %v1555_v47, 0.0  ;;  %v1497_v21 = vadd.s32 %v2529_v56, %v1480_v5 }
 0x35a   : > { %v1571_v26 = vsel %vm682_vm0, %v1553_v37, 0.0  ;;  %vm1514_vm13 = vcmp.lt.s32.totalorder %v1498_v22, 200 }
 0x35b   : > { %1572 = vadd.xlane.f32.xlu1 %v1571_v26  ;;  %vm1513_vm12 = vcmp.lt.s32.totalorder %v1497_v21, 200 }
 0x35d   : > { %1575 = vadd.xlane.f32.xlu0 %v1574_v46  ;;  %v1499_v46 = vadd.s32 %v2529_v56, %v1482_v15 }
 0x35f   : > { %vm1515_vm14 = vcmp.lt.s32.totalorder %v1499_v46, 200 }
 0x361   : > { %1578 = vadd.xlane.f32.xlu0 %v1577_v27 }
 0x367   : > { %v1919_v33 = vpop.f32.mrb[20].mxu0 }
 0x368   : > { %v1399_v34 = vadd.f32 %v1919_v33, %v2527_v55  ;;  %v1390_v35 = vpop.f32.mrb[21].mxu0 }
 0x369   : > { %v1391_v41 = vadd.f32 %v2527_v55, %v1390_v35  ;;  %v1920_v42 = vpop.f32.mrb[22].mxu0 }
 0x36a   : > { %v1443_v43 = vsub.f32 %v1399_v34, %v2377_v7  ;;  %v1402_v45 = vadd.f32 %v1920_v42, %v2527_v55  ;;  %v1393_v48 = vpop.f32.mrb[23].mxu0  ;;  %v1485_v42 = vadd.s32 112, %v2521_v54 }
 0x36b   : > { %v1441_v51 = vsub.f32 %v1391_v41, %v2365_v59  ;;  %v1394_v52 = vadd.f32 %v2527_v55, %v1393_v48  ;;  %v1484_v41 = vadd.s32 104, %v2521_v54  ;;  %v1503_v54 = vadd.s32 %v2529_v56, %v1486_v50 }
 0x36c   : > { %v1444_v53 = vsub.f32 %v1402_v45, %v2375_v6  ;;  %v1459_v57 = vmul.f32 %v1443_v43, %v1443_v43 }
 0x36d   : > { %v1457_v60 = vmul.f32 %v1441_v51, %v1441_v51  ;;  %v1442_v7 = vsub.f32 %v1394_v52, %v2363_v58  ;;  %vm1519_vm3 = vcmp.lt.s32.totalorder %v1503_v54, 200 }
 0x36e   : > { %v1460_v61 = vmul.f32 %v1444_v53, %v1444_v53  ;;  %v1558_v1 = vsel %vm1510_vm9, %v1459_v57, 0.0 }
 0x36f   : > { %v1458_v62 = vmul.f32 %v1442_v7, %v1442_v7  ;;  %v1556_v63 = vsel %vm1508_vm7, %v1457_v60, 0.0  ;;  %v1586_v3 = vsel %vm682_vm0, %v1558_v1, 0.0  ;;  %v1501_v60 = vadd.s32 %v2529_v56, %v1484_v41 }
 0x370   : > { %v1580_v0 = vsel %vm682_vm0, %v1556_v63, 0.0  ;;  %v1559_v2 = vsel %vm1511_vm10, %v1460_v61, 0.0  ;;  %v1502_v7 = vadd.s32 %v2529_v56, %v1485_v42 }
 0x371   : > { %1581 = vadd.xlane.f32.xlu1 %v1580_v0  ;;  %v1557_v59 = vsel %vm1509_vm8, %v1458_v62, 0.0  ;;  %v1589_v58 = vsel %vm682_vm0, %v1559_v2, 0.0  ;;  %vm1517_vm1 = vcmp.lt.s32.totalorder %v1501_v60, 200 }
 0x372   : > { %v1583_v6 = vsel %vm682_vm0, %v1557_v59, 0.0  ;;  %vm1518_vm2 = vcmp.lt.s32.totalorder %v1502_v7, 200 }
 0x373   : > { %1584 = vadd.xlane.f32.xlu0 %v1583_v6 }
 0x375   : > { %1587 = vadd.xlane.f32.xlu1 %v1586_v3 }
 0x377   : > { %1590 = vadd.xlane.f32.xlu0 %v1589_v58 }
 0x37f   : > { %v1923_v9 = vpop.f32.mrb[16].mxu1 }
 0x380   : > { %v1415_v12 = vadd.f32 %v1923_v9, %v2527_v55  ;;  %v1406_v13 = vpop.f32.mrb[17].mxu1 }
 0x381   : > { %v1407_v16 = vadd.f32 %v2527_v55, %v1406_v13  ;;  %v1924_v17 = vpop.f32.mrb[18].mxu1 }
 0x382   : > { %v1447_v36 = vsub.f32 %v1415_v12, %v2411_v44  ;;  %v1418_v18 = vadd.f32 %v1924_v17, %v2527_v55  ;;  %v1409_v19 = vpop.f32.mrb[19].mxu1 }
 0x383   : > { %v1445_v37 = vsub.f32 %v1407_v16, %v2401_v29  ;;  %v1410_v25 = vadd.f32 %v2527_v55, %v1409_v19 }
 0x384   : > { %v1448_v26 = vsub.f32 %v1418_v18, %v2407_v40  ;;  %v1463_v47 = vmul.f32 %v1447_v36, %v1447_v36 }
 0x385   : > { %v1461_v27 = vmul.f32 %v1445_v37, %v1445_v37  ;;  %v1446_v44 = vsub.f32 %v1410_v25, %v2399_v28 }
 0x386   : > { %v1464_v30 = vmul.f32 %v1448_v26, %v1448_v26  ;;  %v1562_v34 = vsel %vm1514_vm13, %v1463_v47, 0.0 }
 0x387   : > { %v1462_v31 = vmul.f32 %v1446_v44, %v1446_v44  ;;  %v1560_v32 = vsel %vm1512_vm11, %v1461_v27, 0.0  ;;  %v1598_v38 = vsel %vm682_vm0, %v1562_v34, 0.0 }
 0x388   : > { %v1592_v33 = vsel %vm682_vm0, %v1560_v32, 0.0  ;;  %v1563_v35 = vsel %vm1515_vm14, %v1464_v30, 0.0 }
 0x389   : > { %1593 = vadd.xlane.f32.xlu1 %v1592_v33  ;;  %v1561_v29 = vsel %vm1513_vm12, %v1462_v31, 0.0  ;;  %v1601_v28 = vsel %vm682_vm0, %v1563_v35, 0.0 }
 0x38a   : > { %v1595_v40 = vsel %vm682_vm0, %v1561_v29, 0.0 }
 0x38b   : > { %1596 = vadd.xlane.f32.xlu0 %v1595_v40 }
 0x38d   : > { %1599 = vadd.xlane.f32.xlu1 %v1598_v38 }
 0x38f   : > { %v1927_v43 = vpop.f32.mrb[20].mxu1  ;;  %1602 = vadd.xlane.f32.xlu0 %v1601_v28 }
 0x390   : > { %v1431_v45 = vadd.f32 %v1927_v43, %v2527_v55  ;;  %v1422_v48 = vpop.f32.mrb[21].mxu1 }
 0x391   : > { %v1423_v51 = vadd.f32 %v2527_v55, %v1422_v48  ;;  %v1928_v52 = vpop.f32.mrb[22].mxu1 }
 0x392   : > { %v1451_v53 = vsub.f32 %v1431_v45, %v2443_v24  ;;  %v1434_v39 = vadd.f32 %v1928_v52, %v2527_v55  ;;  %v1425_v57 = vpop.f32.mrb[23].mxu1 }
 0x393   : > { %v1449_v61 = vsub.f32 %v1423_v51, %v2433_v11  ;;  %v1426_v62 = vadd.f32 %v2527_v55, %v1425_v57 }
 0x394   : > { %v1452_v63 = vsub.f32 %v1434_v39, %v2439_v20  ;;  %v1467_v0 = vmul.f32 %v1451_v53, %v1451_v53 }
 0x395   : > { %v1465_v59 = vmul.f32 %v1449_v61, %v1449_v61  ;;  %v1450_v24 = vsub.f32 %v1426_v62, %v2431_v10 }
 0x396   : > { %v1468_v1 = vmul.f32 %v1452_v63, %v1452_v63  ;;  %v1566_v55 = vsel %vm1518_vm2, %v1467_v0, 0.0 }
 0x397   : > { %v1466_v6 = vmul.f32 %v1450_v24, %v1450_v24  ;;  %v1564_v2 = vsel %vm1516_vm15, %v1465_v59, 0.0  ;;  %v1610_v56 = vsel %vm682_vm0, %v1566_v55, 0.0 }
 0x398   : > { %v1604_v3 = vsel %vm682_vm0, %v1564_v2, 0.0  ;;  %v1567_v58 = vsel %vm1519_vm3, %v1468_v1, 0.0 }
 0x399   : > { %1605 = vadd.xlane.f32.xlu1 %v1604_v3  ;;  %v1565_v11 = vsel %vm1517_vm1, %v1466_v6, 0.0  ;;  %v1613_v10 = vsel %vm682_vm0, %v1567_v58, 0.0 }
 0x39a   : > { %v1607_v20 = vsel %vm682_vm0, %v1565_v11, 0.0 }
 0x39b   : > { %1608 = vadd.xlane.f32.xlu0 %v1607_v20 }
 0x39d   : > { %1611 = vadd.xlane.f32.xlu1 %v1610_v56 }
 0x39f   : > { %1614 = vadd.xlane.f32.xlu0 %v1613_v10 }
 0x3e6   : > { %v1570_v4 = vpop.xlane.xlu0 %1569 }
 0x3e8   : > { %v1573_v5 = vpop.xlane.xlu1 %1572 }
 0x3e9   : > { %v1616_v9 = vadd.f32 %v1573_v5, %v1570_v4 }
 0x3ea   : > { %v1576_v8 = vpop.xlane.xlu0 %1575 }
 0x3eb   : > { %v1617_v13 = vadd.f32 %v1616_v9, %v1576_v8 }
 0x3ee   : > { %v1579_v12 = vpop.xlane.xlu0 %1578 }
 0x3ef   : > { %v1618_v15 = vadd.f32 %v1617_v13, %v1579_v12 }
 0x3fe   : > { %v1582_v14 = vpop.xlane.xlu1 %1581 }
 0x3ff   : > { %v1619_v16 = vadd.f32 %v1618_v15, %v1582_v14 }
 0x400   : > { %v1585_v17 = vpop.xlane.xlu0 %1584 }
 0x401   : > { %v1620_v36 = vadd.f32 %v1619_v16, %v1585_v17 }
 0x402   : > { %v1588_v18 = vpop.xlane.xlu1 %1587 }
 0x403   : > { %v1621_v19 = vadd.f32 %v1620_v36, %v1588_v18 }
 0x404   : > { %v1591_v21 = vpop.xlane.xlu0 %1590 }
 0x405   : > { %v1622_v37 = vadd.f32 %v1621_v19, %v1591_v21 }
 0x416   : > { %v1594_v22 = vpop.xlane.xlu1 %1593 }
 0x417   : > { %v1623_v25 = vadd.f32 %v1622_v37, %v1594_v22 }
 0x418   : > { %v1597_v26 = vpop.xlane.xlu0 %1596 }
 0x419   : > { %v1624_v46 = vadd.f32 %v1623_v25, %v1597_v26 }
 0x41a   : > { %v1600_v47 = vpop.xlane.xlu1 %1599 }
 0x41b   : > { %v1625_v27 = vadd.f32 %v1624_v46, %v1600_v47 }
 0x41c   : > { %v1603_v44 = vpop.xlane.xlu0 %1602 }
 0x41d   : > { %v1626_v30 = vadd.f32 %v1625_v27, %v1603_v44 }
 0x426   : > { %v1606_v31 = vpop.xlane.xlu1 %1605 }
 0x427   : > { %v1627_v32 = vadd.f32 %v1626_v30, %v1606_v31 }
 0x428   : > { %v1609_v33 = vpop.xlane.xlu0 %1608 }
 0x429   : > { %v1628_v29 = vadd.f32 %v1627_v32, %v1609_v33 }
 0x42a   : > { %v1612_v34 = vpop.xlane.xlu1 %1611 }
 0x42b   : > { %v1629_v40 = vadd.f32 %v1628_v29, %v1612_v34 }
 0x42c   : > { %v1615_v35 = vpop.xlane.xlu0 %1614 }
 0x42d   : > { %v1630_v38 = vadd.f32 %v1629_v40, %v1615_v35 }
 0x42f   : > { %v1631_v23 = vrot.slane %v1630_v38, 4 }
 0x431   : > { %v1632_v28 = vadd.f32 %v1631_v23, %v1630_v38 }
 0x433   : > { %v1633_v41 = vrot.slane %v1632_v28, 2 }
 0x435   : > { %v1634_v42 = vadd.f32 %v1633_v41, %v1632_v28 }
 0x437   : > { %v1635_v43 = vrot.slane %v1634_v42, 1 }
 0x439   : > { %v1636_v45 = vadd.f32 %v1635_v43, %v1634_v42 }
 0x43b   : > { %1637 = vst [vmem:[%s400_s11] sm:$0x1] %v1636_v45 }
 0x43c   : > { %2027 = shalt.err (!%p2024_p3)
}
 0x43d   : > { %s2028_s25 = scalar_lea.hbm %s2616_s30, 16  ;;  %s2032_s21 = scalar_lea.hbm %s2668_s10, 32 }
 0x43e   : > { %p2029_p4 = scmp.ne.s32.totalorder %s2616_s30, %s2028_s25  ;;  %p2033_p9 = scmp.lt.u32.totalorder %s2616_s30, %s2668_s10 }
 0x43f   : > { %p2034_p10 = scmp.lt.u32.totalorder %s2032_s21, %s2028_s25  ;;  %p2036_p12 = scmp.lt.u32.totalorder %s2028_s25, %s2616_s30 }
 0x440   : > { %p2030_p7 = pnand %p2029_p4, %p2176_p5 }
 0x441   : > { %p2035_p11 = por %p2034_p10, %p2033_p9 }
 0x442   : > { %p2031_p8 = pneg %p2030_p7 }
 0x443   : > { %p2037_p13 = por %p2036_p12, %p2035_p11 }
 0x445   : > { %p2038_p0 = pnand %p2037_p13, %p2031_p8 }
 0x447   : > { %2041 = shalt.err (!%p2038_p0)
}
 0x448   : > { %1945 = dma.vmem_to_hbm [thread:$0]  (%p2176_p5), %s2618_s12, 16, %s2616_s30, %s1639_s18  }
 0x449 PF: > { %p1951_p1 = scmp.ge.s32.totalorder %s2076_s16, 2  ;;  %s1663_s26 = sand.u32 1, %s2064_s13  }
 0x44a   : > { %s1664_s20 = scalar_lea.sflag [#allocation4], %s1663_s26 }
 0x44b   : > { %p1948_p2 = pnand %p1951_p1, %p2180_p6 }
 0x44d   : > { %2059 = dma.done.wait (!%p1948_p2), %s1664_s20, 16  }
 0x44e   : > { %2061 = vsyncadd (!%p1948_p2), %s1664_s20, 4294967280  ;;  %p20_p3 = scmp.ge.s32.totalorder %s2163_s19, 4   ;;  %s2671_s13 = smov %s2068_s14 }
 0x44f   : > { %s2672_s14 = smov %s2072_s15  ;;  %s2673_s15 = smov %s2174_s22 }
 0x450   : > { %s2674_s16 = smov %s2163_s19  ;;  %22 = sbr.rel (!%p20_p3) target bundleno = 3 (0x3), region = 104 }
 0x457   :  { %1668 = vsyncpa [#allocation4], 1 }
 0x458   :  { %1670 = vsyncpa [#allocation4 + $0x1], 1 }

</bundles_post_ra>
